<compile_context>
chip_gen: v7x
topology: tpu7x:2x2x1
jax: 0.10.0
libtpu: 0.0.40
codegen_flags: <defaults>
</compile_context>

<pallas_src>
import jax
import jax.numpy as jnp
from jax import lax
from jax.experimental import pallas as pl
from jax.experimental.pallas import tpu as pltpu

LN_EPS = 1e-5


def _pick_seq_tile(seq_len, hidden, itemsize=4, max_tile=1024, vmem_budget=20 << 20):
    """Largest divisor of seq_len that is a multiple of 8, <= max_tile, and keeps the
    per-step VMEM footprint (~6 * ts * hidden * itemsize: double-buffered gather +
    double-buffered pos tile + double-buffered out tile) inside the budget."""
    cap = max(8, vmem_budget // (6 * hidden * itemsize))
    cap = min(int(cap), max_tile, seq_len)
    for tsv in range(cap, 0, -1):
        if seq_len % tsv == 0 and tsv % 8 == 0:
            return tsv
    return seq_len  # fallback: full sequence (block == full dim is always legal)


def _emb_ln_kernel(ids_ref, w_hbm, pos_ref, gb_ref, o_ref, wbuf, sem):
    # ids_ref : SMEM (B*S,) int32          (scalar-prefetch)
    # w_hbm   : HBM  (V, H)                (memory_space=pl.ANY; gathered manually)
    # pos_ref : VMEM (TS, H)               (rows [t*TS, (t+1)*TS) of the pos table)
    # gb_ref  : VMEM (2, H) f32            (row 0 = gamma, row 1 = beta)
    # o_ref   : VMEM (TS, H)               (leading batch dim squeezed)
    # wbuf    : VMEM (2, TS, H) scratch    (double-buffered gathered word-emb rows)
    # sem     : DMA semaphores, shape (2,) (one per buffer slot)
    _, ts, hidden = wbuf.shape
    t = pl.program_id(0)                   # sequence-tile index (outer, "parallel")
    b = pl.program_id(1)                   # batch index         (inner, "arbitrary")
    n_b = pl.num_programs(1)
    seq_len = pl.num_programs(0) * ts

    slot = b % 2

    def issue_gather(batch_idx, tile_idx, s):
        base = batch_idx * seq_len + tile_idx * ts

        def body(i, carry):
            tok = ids_ref[base + i]
            pltpu.make_async_copy(
                w_hbm.at[pl.ds(tok, 1)],
                wbuf.at[s].at[pl.ds(i, 1)],
                sem.at[s],
            ).start()
            return carry

        lax.fori_loop(0, ts, body, 0, unroll=min(8, ts))

    # Prime the pipeline at the start of every inner (batch) sweep.  Per-sweep (not
    # per-global-step) priming keeps this correct if the outer axis is core-sharded.
    @pl.when(b == 0)
    def _():
        issue_gather(b, t, slot)

    # Prefetch the NEXT batch's rows for this tile into the other slot; these DMAs
    # run while we compute on the current slot below.
    @pl.when(b + 1 < n_b)
    def _():
        issue_gather(b + 1, t, 1 - slot)

    # ONE bulk wait: the TS row copies into this slot all signal sem[slot]; a single
    # descriptor covering the whole (TS, H) slot waits for the total byte count.
    pltpu.make_async_copy(w_hbm.at[pl.ds(0, ts)], wbuf.at[slot], sem.at[slot]).wait()

    # add + LayerNorm, single-pass statistics (biased variance + eps, as in
    # torch.nn.LayerNorm).  var = E[e^2] - mu^2, clamped at 0 against cancellation.
    e = wbuf[slot].astype(jnp.float32) + pos_ref[...].astype(jnp.float32)   # (TS, H)
    inv_h = 1.0 / hidden
    mu = jnp.sum(e, axis=-1, keepdims=True) * inv_h
    var = jnp.maximum(jnp.sum(e * e, axis=-1, keepdims=True) * inv_h - mu * mu, 0.0)
    y = (e - mu) * lax.rsqrt(var + LN_EPS) * gb_ref[0:1, :] + gb_ref[1:2, :]

    # One unmasked, lane-dense, sublane-full store of the whole tile.
    o_ref[...] = y.astype(o_ref.dtype)


def ljc_bz_embeddings(x_ids, word_emb, pos_emb, gamma, beta, *, seq_tile=None):
    """x_ids: (B, S) int32 token ids. Returns (B, S, H) float32."""
    B, S = x_ids.shape
    V, H = word_emb.shape
    P, _ = pos_emb.shape
    assert S <= P, "seq length exceeds max_position_embeddings"

    itemsize = jnp.dtype(word_emb.dtype).itemsize
    ts = seq_tile if seq_tile is not None else _pick_seq_tile(S, H, itemsize)
    assert S % ts == 0, "sequence tile must divide sequence length"
    n_tiles = S // ts

    # TODO(synk): for very long B*S, stage the current tile's ids from HBM into a
    # small SMEM scratch instead of scalar-prefetching the whole (B*S,) array
    # (1-D SMEM pads to next_pow2(4*B*S) bytes).
    ids_flat = x_ids.reshape(B * S).astype(jnp.int32)
    pos_used = pos_emb[:S]                                      # only rows actually used
    gb = jnp.stack([gamma, beta]).astype(jnp.float32)           # (2, H), VMEM-resident

    grid_spec = pltpu.PrefetchScalarGridSpec(
        num_scalar_prefetch=1,                                  # ids -> SMEM
        grid=(n_tiles, B),                                      # t outer, b inner (fast)
        in_specs=[
            pl.BlockSpec(memory_space=pl.ANY),                  # word_emb stays in HBM
            pl.BlockSpec((ts, H), lambda t, b, ids: (t, 0)),    # resident across b
            pl.BlockSpec((2, H), lambda t, b, ids: (0, 0)),     # gamma/beta, resident
        ],
        out_specs=pl.BlockSpec((None, ts, H), lambda t, b, ids: (b, t, 0)),
        scratch_shapes=[
            pltpu.VMEM((2, ts, H), word_emb.dtype),             # double-buffered gather
            pltpu.SemaphoreType.DMA((2,)),                      # one DMA sem per slot
        ],
    )

    return pl.pallas_call(
        _emb_ln_kernel,
        out_shape=jax.ShapeDtypeStruct((B, S, H), jnp.float32),
        grid_spec=grid_spec,
        compiler_params=pltpu.CompilerParams(
            dimension_semantics=("parallel", "arbitrary"),
            vmem_limit_bytes=32 * 1024 * 1024,
        ),
    )(ids_flat, word_emb, pos_used, gb)


def _reference(x_ids, word_emb, pos_emb, gamma, beta):
    B, S = x_ids.shape
    ie = word_emb[x_ids]                                   # (B, S, H)
    pe = pos_emb[jnp.arange(S)][None, :, :]                # (1, S, H)
    e = ie + pe
    mu = jnp.mean(e, axis=-1, keepdims=True)
    var = jnp.mean((e - mu) ** 2, axis=-1, keepdims=True)
    return (e - mu) * lax.rsqrt(var + LN_EPS) * gamma + beta


if __name__ == "__main__":
    # Small, module-consistent shapes.
    vocab_size = 64
    hidden_dim = 128
    max_position_embeddings = 16
    B, S = 2, 8

    key = jax.random.PRNGKey(0)
    k_ids, k_w, k_p = jax.random.split(key, 3)

    x_ids = jax.random.randint(k_ids, (B, S), 0, vocab_size, dtype=jnp.int32)
    # nn.Embedding default init ~ N(0, 1); LayerNorm: gamma=1, beta=0
    word_emb = jax.random.normal(k_w, (vocab_size, hidden_dim), dtype=jnp.float32)
    pos_emb = jax.random.normal(k_p, (max_position_embeddings, hidden_dim),
                                dtype=jnp.float32)
    gamma = jnp.ones((hidden_dim,), dtype=jnp.float32)
    beta = jnp.zeros((hidden_dim,), dtype=jnp.float32)

    out = ljc_bz_embeddings(x_ids, word_emb, pos_emb, gamma, beta)
    out = jax.block_until_ready(out)

    ref = _reference(x_ids, word_emb, pos_emb, gamma, beta)
    assert out.shape == (B, S, hidden_dim)
    assert jnp.allclose(out, ref, atol=1e-5, rtol=1e-5), "mismatch vs reference"

    print("KERNEL_OK")
</pallas_src>

<mosaic_0001>
module attributes {stable_mosaic.version = 11 : i64} {
  func.func @_emb_ln_kernel(%arg0: i32, %arg1: i32, %arg2: memref<16xi32, #tpu.memory_space<smem>>, %arg3: memref<64x128xf32, #tpu.memory_space<any>>, %arg4: memref<8x128xf32, #tpu.memory_space<vmem>>, %arg5: memref<2x128xf32, #tpu.memory_space<vmem>>, %arg6: memref<1x8x128xf32, #tpu.memory_space<vmem>>, %arg7: memref<2x8x128xf32, #tpu.memory_space<vmem>>, %arg8: memref<2x!tpu.dma_semaphore, #tpu.memory_space<semaphore_mem>>) attributes {dimension_semantics = [#tpu.dimension_semantics<parallel>, #tpu.dimension_semantics<arbitrary>], iteration_bounds = array<i64: 1, 2>, scalar_prefetch = 1 : i64, scratch_operands = 2 : i64, tpu.core_type = #tpu.core_type<tc>, window_params = [{}, {transform_indices = @transform_1, window_bounds = array<i64: 8, 128>}, {pipeline_mode = #tpu.pipeline_mode<synchronous>, transform_indices = @transform_2, window_bounds = array<i64: 2, 128>}, {transform_indices = @transform_3, window_bounds = array<i64: 1, 8, 128>}]} {
    %c2_i32 = arith.constant 2 : i32
    %c0_i32 = arith.constant 0 : i32
    %0 = arith.cmpi eq, %c2_i32, %c0_i32 : i32
    %c1_i32 = arith.constant 1 : i32
    %1 = arith.select %0, %c1_i32, %c2_i32 : i32
    %2 = arith.remsi %arg1, %1 : i32
    %c0_i32_0 = arith.constant 0 : i32
    %3 = arith.cmpi ne, %2, %c0_i32_0 : i32
    %c0_i32_1 = arith.constant 0 : i32
    %4 = arith.cmpi slt, %2, %c0_i32_1 : i32
    %c0_i32_2 = arith.constant 0 : i32
    %5 = arith.cmpi slt, %1, %c0_i32_2 : i32
    %6 = arith.xori %4, %5 : i1
    %7 = arith.andi %6, %3 : i1
    %8 = arith.addi %2, %1 : i32
    %9 = arith.select %7, %8, %2 : i32
    %c0_i32_3 = arith.constant 0 : i32
    %10 = arith.cmpi eq, %arg1, %c0_i32_3 : i32
    %11 = arith.extui %10 : i1 to i32
    %c0_i32_4 = arith.constant 0 : i32
    %12 = arith.cmpi ne, %11, %c0_i32_4 : i32
    scf.if %12 {
      %c8_i32 = arith.constant 8 : i32
      %56 = arith.muli %arg1, %c8_i32 : i32
      %c8_i32_26 = arith.constant 8 : i32
      %57 = arith.muli %arg0, %c8_i32_26 : i32
      %58 = arith.addi %56, %57 : i32
      %c0_i32_27 = arith.constant 0 : i32
      %59 = arith.addi %58, %c0_i32_27 : i32
      %60 = arith.index_cast %59 : i32 to index
      %61 = memref.load %arg2[%60] : memref<16xi32, #tpu.memory_space<smem>>
      %c0_i32_28 = arith.constant 0 : i32
      %62 = tpu.memref_slice %arg3[%61, %c0_i32_28] : memref<64x128xf32, #tpu.memory_space<any>> -> memref<1x128xf32, #tpu.memory_space<any>>
      %c0_i32_29 = arith.constant 0 : i32
      %c0_i32_30 = arith.constant 0 : i32
      %63 = tpu.memref_slice %arg7[%9, %c0_i32_29, %c0_i32_30] : memref<2x8x128xf32, #tpu.memory_space<vmem>> -> memref<1x8x128xf32, #tpu.memory_space<vmem>>
      %64 = tpu.memref_squeeze %63 : memref<1x8x128xf32, #tpu.memory_space<vmem>> -> memref<8x128xf32, #tpu.memory_space<vmem>>
      %c0_i32_31 = arith.constant 0 : i32
      %65 = tpu.memref_slice %64[%c0_i32_27, %c0_i32_31] : memref<8x128xf32, #tpu.memory_space<vmem>> -> memref<1x128xf32, #tpu.memory_space<vmem>>
      %66 = tpu.memref_slice %arg8[%9] : memref<2x!tpu.dma_semaphore, #tpu.memory_space<semaphore_mem>> -> memref<1x!tpu.dma_semaphore, #tpu.memory_space<semaphore_mem>>
      %67 = tpu.memref_squeeze %66 : memref<1x!tpu.dma_semaphore, #tpu.memory_space<semaphore_mem>> -> memref<!tpu.dma_semaphore, #tpu.memory_space<semaphore_mem>>
      tpu.enqueue_dma source(%62 : memref<1x128xf32, #tpu.memory_space<any>>) target(%65 : memref<1x128xf32, #tpu.memory_space<vmem>>) target_semaphore(%67 : memref<!tpu.dma_semaphore, #tpu.memory_space<semaphore_mem>>)
      %c1_i32_32 = arith.constant 1 : i32
      %68 = arith.addi %58, %c1_i32_32 : i32
      %69 = arith.index_cast %68 : i32 to index
      %70 = memref.load %arg2[%69] : memref<16xi32, #tpu.memory_space<smem>>
      %c0_i32_33 = arith.constant 0 : i32
      %71 = tpu.memref_slice %arg3[%70, %c0_i32_33] : memref<64x128xf32, #tpu.memory_space<any>> -> memref<1x128xf32, #tpu.memory_space<any>>
      %c0_i32_34 = arith.constant 0 : i32
      %c0_i32_35 = arith.constant 0 : i32
      %72 = tpu.memref_slice %arg7[%9, %c0_i32_34, %c0_i32_35] : memref<2x8x128xf32, #tpu.memory_space<vmem>> -> memref<1x8x128xf32, #tpu.memory_space<vmem>>
      %73 = tpu.memref_squeeze %72 : memref<1x8x128xf32, #tpu.memory_space<vmem>> -> memref<8x128xf32, #tpu.memory_space<vmem>>
      %c0_i32_36 = arith.constant 0 : i32
      %74 = tpu.memref_slice %73[%c1_i32_32, %c0_i32_36] : memref<8x128xf32, #tpu.memory_space<vmem>> -> memref<1x128xf32, #tpu.memory_space<vmem>>
      %75 = tpu.memref_slice %arg8[%9] : memref<2x!tpu.dma_semaphore, #tpu.memory_space<semaphore_mem>> -> memref<1x!tpu.dma_semaphore, #tpu.memory_space<semaphore_mem>>
      %76 = tpu.memref_squeeze %75 : memref<1x!tpu.dma_semaphore, #tpu.memory_space<semaphore_mem>> -> memref<!tpu.dma_semaphore, #tpu.memory_space<semaphore_mem>>
      tpu.enqueue_dma source(%71 : memref<1x128xf32, #tpu.memory_space<any>>) target(%74 : memref<1x128xf32, #tpu.memory_space<vmem>>) target_semaphore(%76 : memref<!tpu.dma_semaphore, #tpu.memory_space<semaphore_mem>>)
      %c2_i32_37 = arith.constant 2 : i32
      %77 = arith.addi %58, %c2_i32_37 : i32
      %78 = arith.index_cast %77 : i32 to index
      %79 = memref.load %arg2[%78] : memref<16xi32, #tpu.memory_space<smem>>
      %c0_i32_38 = arith.constant 0 : i32
      %80 = tpu.memref_slice %arg3[%79, %c0_i32_38] : memref<64x128xf32, #tpu.memory_space<any>> -> memref<1x128xf32, #tpu.memory_space<any>>
      %c0_i32_39 = arith.constant 0 : i32
      %c0_i32_40 = arith.constant 0 : i32
      %81 = tpu.memref_slice %arg7[%9, %c0_i32_39, %c0_i32_40] : memref<2x8x128xf32, #tpu.memory_space<vmem>> -> memref<1x8x128xf32, #tpu.memory_space<vmem>>
      %82 = tpu.memref_squeeze %81 : memref<1x8x128xf32, #tpu.memory_space<vmem>> -> memref<8x128xf32, #tpu.memory_space<vmem>>
      %c0_i32_41 = arith.constant 0 : i32
      %83 = tpu.memref_slice %82[%c2_i32_37, %c0_i32_41] : memref<8x128xf32, #tpu.memory_space<vmem>> -> memref<1x128xf32, #tpu.memory_space<vmem>>
      %84 = tpu.memref_slice %arg8[%9] : memref<2x!tpu.dma_semaphore, #tpu.memory_space<semaphore_mem>> -> memref<1x!tpu.dma_semaphore, #tpu.memory_space<semaphore_mem>>
      %85 = tpu.memref_squeeze %84 : memref<1x!tpu.dma_semaphore, #tpu.memory_space<semaphore_mem>> -> memref<!tpu.dma_semaphore, #tpu.memory_space<semaphore_mem>>
      tpu.enqueue_dma source(%80 : memref<1x128xf32, #tpu.memory_space<any>>) target(%83 : memref<1x128xf32, #tpu.memory_space<vmem>>) target_semaphore(%85 : memref<!tpu.dma_semaphore, #tpu.memory_space<semaphore_mem>>)
      %c3_i32 = arith.constant 3 : i32
      %86 = arith.addi %58, %c3_i32 : i32
      %87 = arith.index_cast %86 : i32 to index
      %88 = memref.load %arg2[%87] : memref<16xi32, #tpu.memory_space<smem>>
      %c0_i32_42 = arith.constant 0 : i32
      %89 = tpu.memref_slice %arg3[%88, %c0_i32_42] : memref<64x128xf32, #tpu.memory_space<any>> -> memref<1x128xf32, #tpu.memory_space<any>>
      %c0_i32_43 = arith.constant 0 : i32
      %c0_i32_44 = arith.constant 0 : i32
      %90 = tpu.memref_slice %arg7[%9, %c0_i32_43, %c0_i32_44] : memref<2x8x128xf32, #tpu.memory_space<vmem>> -> memref<1x8x128xf32, #tpu.memory_space<vmem>>
      %91 = tpu.memref_squeeze %90 : memref<1x8x128xf32, #tpu.memory_space<vmem>> -> memref<8x128xf32, #tpu.memory_space<vmem>>
      %c0_i32_45 = arith.constant 0 : i32
      %92 = tpu.memref_slice %91[%c3_i32, %c0_i32_45] : memref<8x128xf32, #tpu.memory_space<vmem>> -> memref<1x128xf32, #tpu.memory_space<vmem>>
      %93 = tpu.memref_slice %arg8[%9] : memref<2x!tpu.dma_semaphore, #tpu.memory_space<semaphore_mem>> -> memref<1x!tpu.dma_semaphore, #tpu.memory_space<semaphore_mem>>
      %94 = tpu.memref_squeeze %93 : memref<1x!tpu.dma_semaphore, #tpu.memory_space<semaphore_mem>> -> memref<!tpu.dma_semaphore, #tpu.memory_space<semaphore_mem>>
      tpu.enqueue_dma source(%89 : memref<1x128xf32, #tpu.memory_space<any>>) target(%92 : memref<1x128xf32, #tpu.memory_space<vmem>>) target_semaphore(%94 : memref<!tpu.dma_semaphore, #tpu.memory_space<semaphore_mem>>)
      %c4_i32 = arith.constant 4 : i32
      %95 = arith.addi %58, %c4_i32 : i32
      %96 = arith.index_cast %95 : i32 to index
      %97 = memref.load %arg2[%96] : memref<16xi32, #tpu.memory_space<smem>>
      %c0_i32_46 = arith.constant 0 : i32
      %98 = tpu.memref_slice %arg3[%97, %c0_i32_46] : memref<64x128xf32, #tpu.memory_space<any>> -> memref<1x128xf32, #tpu.memory_space<any>>
      %c0_i32_47 = arith.constant 0 : i32
      %c0_i32_48 = arith.constant 0 : i32
      %99 = tpu.memref_slice %arg7[%9, %c0_i32_47, %c0_i32_48] : memref<2x8x128xf32, #tpu.memory_space<vmem>> -> memref<1x8x128xf32, #tpu.memory_space<vmem>>
      %100 = tpu.memref_squeeze %99 : memref<1x8x128xf32, #tpu.memory_space<vmem>> -> memref<8x128xf32, #tpu.memory_space<vmem>>
      %c0_i32_49 = arith.constant 0 : i32
      %101 = tpu.memref_slice %100[%c4_i32, %c0_i32_49] : memref<8x128xf32, #tpu.memory_space<vmem>> -> memref<1x128xf32, #tpu.memory_space<vmem>>
      %102 = tpu.memref_slice %arg8[%9] : memref<2x!tpu.dma_semaphore, #tpu.memory_space<semaphore_mem>> -> memref<1x!tpu.dma_semaphore, #tpu.memory_space<semaphore_mem>>
      %103 = tpu.memref_squeeze %102 : memref<1x!tpu.dma_semaphore, #tpu.memory_space<semaphore_mem>> -> memref<!tpu.dma_semaphore, #tpu.memory_space<semaphore_mem>>
      tpu.enqueue_dma source(%98 : memref<1x128xf32, #tpu.memory_space<any>>) target(%101 : memref<1x128xf32, #tpu.memory_space<vmem>>) target_semaphore(%103 : memref<!tpu.dma_semaphore, #tpu.memory_space<semaphore_mem>>)
      %c5_i32 = arith.constant 5 : i32
      %104 = arith.addi %58, %c5_i32 : i32
      %105 = arith.index_cast %104 : i32 to index
      %106 = memref.load %arg2[%105] : memref<16xi32, #tpu.memory_space<smem>>
      %c0_i32_50 = arith.constant 0 : i32
      %107 = tpu.memref_slice %arg3[%106, %c0_i32_50] : memref<64x128xf32, #tpu.memory_space<any>> -> memref<1x128xf32, #tpu.memory_space<any>>
      %c0_i32_51 = arith.constant 0 : i32
      %c0_i32_52 = arith.constant 0 : i32
      %108 = tpu.memref_slice %arg7[%9, %c0_i32_51, %c0_i32_52] : memref<2x8x128xf32, #tpu.memory_space<vmem>> -> memref<1x8x128xf32, #tpu.memory_space<vmem>>
      %109 = tpu.memref_squeeze %108 : memref<1x8x128xf32, #tpu.memory_space<vmem>> -> memref<8x128xf32, #tpu.memory_space<vmem>>
      %c0_i32_53 = arith.constant 0 : i32
      %110 = tpu.memref_slice %109[%c5_i32, %c0_i32_53] : memref<8x128xf32, #tpu.memory_space<vmem>> -> memref<1x128xf32, #tpu.memory_space<vmem>>
      %111 = tpu.memref_slice %arg8[%9] : memref<2x!tpu.dma_semaphore, #tpu.memory_space<semaphore_mem>> -> memref<1x!tpu.dma_semaphore, #tpu.memory_space<semaphore_mem>>
      %112 = tpu.memref_squeeze %111 : memref<1x!tpu.dma_semaphore, #tpu.memory_space<semaphore_mem>> -> memref<!tpu.dma_semaphore, #tpu.memory_space<semaphore_mem>>
      tpu.enqueue_dma source(%107 : memref<1x128xf32, #tpu.memory_space<any>>) target(%110 : memref<1x128xf32, #tpu.memory_space<vmem>>) target_semaphore(%112 : memref<!tpu.dma_semaphore, #tpu.memory_space<semaphore_mem>>)
      %c6_i32 = arith.constant 6 : i32
      %113 = arith.addi %58, %c6_i32 : i32
      %114 = arith.index_cast %113 : i32 to index
      %115 = memref.load %arg2[%114] : memref<16xi32, #tpu.memory_space<smem>>
      %c0_i32_54 = arith.constant 0 : i32
      %116 = tpu.memref_slice %arg3[%115, %c0_i32_54] : memref<64x128xf32, #tpu.memory_space<any>> -> memref<1x128xf32, #tpu.memory_space<any>>
      %c0_i32_55 = arith.constant 0 : i32
      %c0_i32_56 = arith.constant 0 : i32
      %117 = tpu.memref_slice %arg7[%9, %c0_i32_55, %c0_i32_56] : memref<2x8x128xf32, #tpu.memory_space<vmem>> -> memref<1x8x128xf32, #tpu.memory_space<vmem>>
      %118 = tpu.memref_squeeze %117 : memref<1x8x128xf32, #tpu.memory_space<vmem>> -> memref<8x128xf32, #tpu.memory_space<vmem>>
      %c0_i32_57 = arith.constant 0 : i32
      %119 = tpu.memref_slice %118[%c6_i32, %c0_i32_57] : memref<8x128xf32, #tpu.memory_space<vmem>> -> memref<1x128xf32, #tpu.memory_space<vmem>>
      %120 = tpu.memref_slice %arg8[%9] : memref<2x!tpu.dma_semaphore, #tpu.memory_space<semaphore_mem>> -> memref<1x!tpu.dma_semaphore, #tpu.memory_space<semaphore_mem>>
      %121 = tpu.memref_squeeze %120 : memref<1x!tpu.dma_semaphore, #tpu.memory_space<semaphore_mem>> -> memref<!tpu.dma_semaphore, #tpu.memory_space<semaphore_mem>>
      tpu.enqueue_dma source(%116 : memref<1x128xf32, #tpu.memory_space<any>>) target(%119 : memref<1x128xf32, #tpu.memory_space<vmem>>) target_semaphore(%121 : memref<!tpu.dma_semaphore, #tpu.memory_space<semaphore_mem>>)
      %c7_i32 = arith.constant 7 : i32
      %122 = arith.addi %58, %c7_i32 : i32
      %123 = arith.index_cast %122 : i32 to index
      %124 = memref.load %arg2[%123] : memref<16xi32, #tpu.memory_space<smem>>
      %c0_i32_58 = arith.constant 0 : i32
      %125 = tpu.memref_slice %arg3[%124, %c0_i32_58] : memref<64x128xf32, #tpu.memory_space<any>> -> memref<1x128xf32, #tpu.memory_space<any>>
      %c0_i32_59 = arith.constant 0 : i32
      %c0_i32_60 = arith.constant 0 : i32
      %126 = tpu.memref_slice %arg7[%9, %c0_i32_59, %c0_i32_60] : memref<2x8x128xf32, #tpu.memory_space<vmem>> -> memref<1x8x128xf32, #tpu.memory_space<vmem>>
      %127 = tpu.memref_squeeze %126 : memref<1x8x128xf32, #tpu.memory_space<vmem>> -> memref<8x128xf32, #tpu.memory_space<vmem>>
      %c0_i32_61 = arith.constant 0 : i32
      %128 = tpu.memref_slice %127[%c7_i32, %c0_i32_61] : memref<8x128xf32, #tpu.memory_space<vmem>> -> memref<1x128xf32, #tpu.memory_space<vmem>>
      %129 = tpu.memref_slice %arg8[%9] : memref<2x!tpu.dma_semaphore, #tpu.memory_space<semaphore_mem>> -> memref<1x!tpu.dma_semaphore, #tpu.memory_space<semaphore_mem>>
      %130 = tpu.memref_squeeze %129 : memref<1x!tpu.dma_semaphore, #tpu.memory_space<semaphore_mem>> -> memref<!tpu.dma_semaphore, #tpu.memory_space<semaphore_mem>>
      tpu.enqueue_dma source(%125 : memref<1x128xf32, #tpu.memory_space<any>>) target(%128 : memref<1x128xf32, #tpu.memory_space<vmem>>) target_semaphore(%130 : memref<!tpu.dma_semaphore, #tpu.memory_space<semaphore_mem>>)
      %c8_i32_62 = arith.constant 8 : i32
    } else {
    }
    %c1_i32_5 = arith.constant 1 : i32
    %13 = arith.addi %arg1, %c1_i32_5 : i32
    %c2_i32_6 = arith.constant 2 : i32
    %14 = arith.cmpi slt, %13, %c2_i32_6 : i32
    %15 = arith.extui %14 : i1 to i32
    %c0_i32_7 = arith.constant 0 : i32
    %16 = arith.cmpi ne, %15, %c0_i32_7 : i32
    scf.if %16 {
      %c1_i32_26 = arith.constant 1 : i32
      %56 = arith.addi %arg1, %c1_i32_26 : i32
      %c1_i32_27 = arith.constant 1 : i32
      %57 = arith.subi %c1_i32_27, %9 : i32
      %c8_i32 = arith.constant 8 : i32
      %58 = arith.muli %56, %c8_i32 : i32
      %c8_i32_28 = arith.constant 8 : i32
      %59 = arith.muli %arg0, %c8_i32_28 : i32
      %60 = arith.addi %58, %59 : i32
      %c0_i32_29 = arith.constant 0 : i32
      %61 = arith.addi %60, %c0_i32_29 : i32
      %62 = arith.index_cast %61 : i32 to index
      %63 = memref.load %arg2[%62] : memref<16xi32, #tpu.memory_space<smem>>
      %c0_i32_30 = arith.constant 0 : i32
      %64 = tpu.memref_slice %arg3[%63, %c0_i32_30] : memref<64x128xf32, #tpu.memory_space<any>> -> memref<1x128xf32, #tpu.memory_space<any>>
      %c0_i32_31 = arith.constant 0 : i32
      %c0_i32_32 = arith.constant 0 : i32
      %65 = tpu.memref_slice %arg7[%57, %c0_i32_31, %c0_i32_32] : memref<2x8x128xf32, #tpu.memory_space<vmem>> -> memref<1x8x128xf32, #tpu.memory_space<vmem>>
      %66 = tpu.memref_squeeze %65 : memref<1x8x128xf32, #tpu.memory_space<vmem>> -> memref<8x128xf32, #tpu.memory_space<vmem>>
      %c0_i32_33 = arith.constant 0 : i32
      %67 = tpu.memref_slice %66[%c0_i32_29, %c0_i32_33] : memref<8x128xf32, #tpu.memory_space<vmem>> -> memref<1x128xf32, #tpu.memory_space<vmem>>
      %68 = tpu.memref_slice %arg8[%57] : memref<2x!tpu.dma_semaphore, #tpu.memory_space<semaphore_mem>> -> memref<1x!tpu.dma_semaphore, #tpu.memory_space<semaphore_mem>>
      %69 = tpu.memref_squeeze %68 : memref<1x!tpu.dma_semaphore, #tpu.memory_space<semaphore_mem>> -> memref<!tpu.dma_semaphore, #tpu.memory_space<semaphore_mem>>
      tpu.enqueue_dma source(%64 : memref<1x128xf32, #tpu.memory_space<any>>) target(%67 : memref<1x128xf32, #tpu.memory_space<vmem>>) target_semaphore(%69 : memref<!tpu.dma_semaphore, #tpu.memory_space<semaphore_mem>>)
      %c1_i32_34 = arith.constant 1 : i32
      %70 = arith.addi %60, %c1_i32_34 : i32
      %71 = arith.index_cast %70 : i32 to index
      %72 = memref.load %arg2[%71] : memref<16xi32, #tpu.memory_space<smem>>
      %c0_i32_35 = arith.constant 0 : i32
      %73 = tpu.memref_slice %arg3[%72, %c0_i32_35] : memref<64x128xf32, #tpu.memory_space<any>> -> memref<1x128xf32, #tpu.memory_space<any>>
      %c0_i32_36 = arith.constant 0 : i32
      %c0_i32_37 = arith.constant 0 : i32
      %74 = tpu.memref_slice %arg7[%57, %c0_i32_36, %c0_i32_37] : memref<2x8x128xf32, #tpu.memory_space<vmem>> -> memref<1x8x128xf32, #tpu.memory_space<vmem>>
      %75 = tpu.memref_squeeze %74 : memref<1x8x128xf32, #tpu.memory_space<vmem>> -> memref<8x128xf32, #tpu.memory_space<vmem>>
      %c0_i32_38 = arith.constant 0 : i32
      %76 = tpu.memref_slice %75[%c1_i32_34, %c0_i32_38] : memref<8x128xf32, #tpu.memory_space<vmem>> -> memref<1x128xf32, #tpu.memory_space<vmem>>
      %77 = tpu.memref_slice %arg8[%57] : memref<2x!tpu.dma_semaphore, #tpu.memory_space<semaphore_mem>> -> memref<1x!tpu.dma_semaphore, #tpu.memory_space<semaphore_mem>>
      %78 = tpu.memref_squeeze %77 : memref<1x!tpu.dma_semaphore, #tpu.memory_space<semaphore_mem>> -> memref<!tpu.dma_semaphore, #tpu.memory_space<semaphore_mem>>
      tpu.enqueue_dma source(%73 : memref<1x128xf32, #tpu.memory_space<any>>) target(%76 : memref<1x128xf32, #tpu.memory_space<vmem>>) target_semaphore(%78 : memref<!tpu.dma_semaphore, #tpu.memory_space<semaphore_mem>>)
      %c2_i32_39 = arith.constant 2 : i32
      %79 = arith.addi %60, %c2_i32_39 : i32
      %80 = arith.index_cast %79 : i32 to index
      %81 = memref.load %arg2[%80] : memref<16xi32, #tpu.memory_space<smem>>
      %c0_i32_40 = arith.constant 0 : i32
      %82 = tpu.memref_slice %arg3[%81, %c0_i32_40] : memref<64x128xf32, #tpu.memory_space<any>> -> memref<1x128xf32, #tpu.memory_space<any>>
      %c0_i32_41 = arith.constant 0 : i32
      %c0_i32_42 = arith.constant 0 : i32
      %83 = tpu.memref_slice %arg7[%57, %c0_i32_41, %c0_i32_42] : memref<2x8x128xf32, #tpu.memory_space<vmem>> -> memref<1x8x128xf32, #tpu.memory_space<vmem>>
      %84 = tpu.memref_squeeze %83 : memref<1x8x128xf32, #tpu.memory_space<vmem>> -> memref<8x128xf32, #tpu.memory_space<vmem>>
      %c0_i32_43 = arith.constant 0 : i32
      %85 = tpu.memref_slice %84[%c2_i32_39, %c0_i32_43] : memref<8x128xf32, #tpu.memory_space<vmem>> -> memref<1x128xf32, #tpu.memory_space<vmem>>
      %86 = tpu.memref_slice %arg8[%57] : memref<2x!tpu.dma_semaphore, #tpu.memory_space<semaphore_mem>> -> memref<1x!tpu.dma_semaphore, #tpu.memory_space<semaphore_mem>>
      %87 = tpu.memref_squeeze %86 : memref<1x!tpu.dma_semaphore, #tpu.memory_space<semaphore_mem>> -> memref<!tpu.dma_semaphore, #tpu.memory_space<semaphore_mem>>
      tpu.enqueue_dma source(%82 : memref<1x128xf32, #tpu.memory_space<any>>) target(%85 : memref<1x128xf32, #tpu.memory_space<vmem>>) target_semaphore(%87 : memref<!tpu.dma_semaphore, #tpu.memory_space<semaphore_mem>>)
      %c3_i32 = arith.constant 3 : i32
      %88 = arith.addi %60, %c3_i32 : i32
      %89 = arith.index_cast %88 : i32 to index
      %90 = memref.load %arg2[%89] : memref<16xi32, #tpu.memory_space<smem>>
      %c0_i32_44 = arith.constant 0 : i32
      %91 = tpu.memref_slice %arg3[%90, %c0_i32_44] : memref<64x128xf32, #tpu.memory_space<any>> -> memref<1x128xf32, #tpu.memory_space<any>>
      %c0_i32_45 = arith.constant 0 : i32
      %c0_i32_46 = arith.constant 0 : i32
      %92 = tpu.memref_slice %arg7[%57, %c0_i32_45, %c0_i32_46] : memref<2x8x128xf32, #tpu.memory_space<vmem>> -> memref<1x8x128xf32, #tpu.memory_space<vmem>>
      %93 = tpu.memref_squeeze %92 : memref<1x8x128xf32, #tpu.memory_space<vmem>> -> memref<8x128xf32, #tpu.memory_space<vmem>>
      %c0_i32_47 = arith.constant 0 : i32
      %94 = tpu.memref_slice %93[%c3_i32, %c0_i32_47] : memref<8x128xf32, #tpu.memory_space<vmem>> -> memref<1x128xf32, #tpu.memory_space<vmem>>
      %95 = tpu.memref_slice %arg8[%57] : memref<2x!tpu.dma_semaphore, #tpu.memory_space<semaphore_mem>> -> memref<1x!tpu.dma_semaphore, #tpu.memory_space<semaphore_mem>>
      %96 = tpu.memref_squeeze %95 : memref<1x!tpu.dma_semaphore, #tpu.memory_space<semaphore_mem>> -> memref<!tpu.dma_semaphore, #tpu.memory_space<semaphore_mem>>
      tpu.enqueue_dma source(%91 : memref<1x128xf32, #tpu.memory_space<any>>) target(%94 : memref<1x128xf32, #tpu.memory_space<vmem>>) target_semaphore(%96 : memref<!tpu.dma_semaphore, #tpu.memory_space<semaphore_mem>>)
      %c4_i32 = arith.constant 4 : i32
      %97 = arith.addi %60, %c4_i32 : i32
      %98 = arith.index_cast %97 : i32 to index
      %99 = memref.load %arg2[%98] : memref<16xi32, #tpu.memory_space<smem>>
      %c0_i32_48 = arith.constant 0 : i32
      %100 = tpu.memref_slice %arg3[%99, %c0_i32_48] : memref<64x128xf32, #tpu.memory_space<any>> -> memref<1x128xf32, #tpu.memory_space<any>>
      %c0_i32_49 = arith.constant 0 : i32
      %c0_i32_50 = arith.constant 0 : i32
      %101 = tpu.memref_slice %arg7[%57, %c0_i32_49, %c0_i32_50] : memref<2x8x128xf32, #tpu.memory_space<vmem>> -> memref<1x8x128xf32, #tpu.memory_space<vmem>>
      %102 = tpu.memref_squeeze %101 : memref<1x8x128xf32, #tpu.memory_space<vmem>> -> memref<8x128xf32, #tpu.memory_space<vmem>>
      %c0_i32_51 = arith.constant 0 : i32
      %103 = tpu.memref_slice %102[%c4_i32, %c0_i32_51] : memref<8x128xf32, #tpu.memory_space<vmem>> -> memref<1x128xf32, #tpu.memory_space<vmem>>
      %104 = tpu.memref_slice %arg8[%57] : memref<2x!tpu.dma_semaphore, #tpu.memory_space<semaphore_mem>> -> memref<1x!tpu.dma_semaphore, #tpu.memory_space<semaphore_mem>>
      %105 = tpu.memref_squeeze %104 : memref<1x!tpu.dma_semaphore, #tpu.memory_space<semaphore_mem>> -> memref<!tpu.dma_semaphore, #tpu.memory_space<semaphore_mem>>
      tpu.enqueue_dma source(%100 : memref<1x128xf32, #tpu.memory_space<any>>) target(%103 : memref<1x128xf32, #tpu.memory_space<vmem>>) target_semaphore(%105 : memref<!tpu.dma_semaphore, #tpu.memory_space<semaphore_mem>>)
      %c5_i32 = arith.constant 5 : i32
      %106 = arith.addi %60, %c5_i32 : i32
      %107 = arith.index_cast %106 : i32 to index
      %108 = memref.load %arg2[%107] : memref<16xi32, #tpu.memory_space<smem>>
      %c0_i32_52 = arith.constant 0 : i32
      %109 = tpu.memref_slice %arg3[%108, %c0_i32_52] : memref<64x128xf32, #tpu.memory_space<any>> -> memref<1x128xf32, #tpu.memory_space<any>>
      %c0_i32_53 = arith.constant 0 : i32
      %c0_i32_54 = arith.constant 0 : i32
      %110 = tpu.memref_slice %arg7[%57, %c0_i32_53, %c0_i32_54] : memref<2x8x128xf32, #tpu.memory_space<vmem>> -> memref<1x8x128xf32, #tpu.memory_space<vmem>>
      %111 = tpu.memref_squeeze %110 : memref<1x8x128xf32, #tpu.memory_space<vmem>> -> memref<8x128xf32, #tpu.memory_space<vmem>>
      %c0_i32_55 = arith.constant 0 : i32
      %112 = tpu.memref_slice %111[%c5_i32, %c0_i32_55] : memref<8x128xf32, #tpu.memory_space<vmem>> -> memref<1x128xf32, #tpu.memory_space<vmem>>
      %113 = tpu.memref_slice %arg8[%57] : memref<2x!tpu.dma_semaphore, #tpu.memory_space<semaphore_mem>> -> memref<1x!tpu.dma_semaphore, #tpu.memory_space<semaphore_mem>>
      %114 = tpu.memref_squeeze %113 : memref<1x!tpu.dma_semaphore, #tpu.memory_space<semaphore_mem>> -> memref<!tpu.dma_semaphore, #tpu.memory_space<semaphore_mem>>
      tpu.enqueue_dma source(%109 : memref<1x128xf32, #tpu.memory_space<any>>) target(%112 : memref<1x128xf32, #tpu.memory_space<vmem>>) target_semaphore(%114 : memref<!tpu.dma_semaphore, #tpu.memory_space<semaphore_mem>>)
      %c6_i32 = arith.constant 6 : i32
      %115 = arith.addi %60, %c6_i32 : i32
      %116 = arith.index_cast %115 : i32 to index
      %117 = memref.load %arg2[%116] : memref<16xi32, #tpu.memory_space<smem>>
      %c0_i32_56 = arith.constant 0 : i32
      %118 = tpu.memref_slice %arg3[%117, %c0_i32_56] : memref<64x128xf32, #tpu.memory_space<any>> -> memref<1x128xf32, #tpu.memory_space<any>>
      %c0_i32_57 = arith.constant 0 : i32
      %c0_i32_58 = arith.constant 0 : i32
      %119 = tpu.memref_slice %arg7[%57, %c0_i32_57, %c0_i32_58] : memref<2x8x128xf32, #tpu.memory_space<vmem>> -> memref<1x8x128xf32, #tpu.memory_space<vmem>>
      %120 = tpu.memref_squeeze %119 : memref<1x8x128xf32, #tpu.memory_space<vmem>> -> memref<8x128xf32, #tpu.memory_space<vmem>>
      %c0_i32_59 = arith.constant 0 : i32
      %121 = tpu.memref_slice %120[%c6_i32, %c0_i32_59] : memref<8x128xf32, #tpu.memory_space<vmem>> -> memref<1x128xf32, #tpu.memory_space<vmem>>
      %122 = tpu.memref_slice %arg8[%57] : memref<2x!tpu.dma_semaphore, #tpu.memory_space<semaphore_mem>> -> memref<1x!tpu.dma_semaphore, #tpu.memory_space<semaphore_mem>>
      %123 = tpu.memref_squeeze %122 : memref<1x!tpu.dma_semaphore, #tpu.memory_space<semaphore_mem>> -> memref<!tpu.dma_semaphore, #tpu.memory_space<semaphore_mem>>
      tpu.enqueue_dma source(%118 : memref<1x128xf32, #tpu.memory_space<any>>) target(%121 : memref<1x128xf32, #tpu.memory_space<vmem>>) target_semaphore(%123 : memref<!tpu.dma_semaphore, #tpu.memory_space<semaphore_mem>>)
      %c7_i32 = arith.constant 7 : i32
      %124 = arith.addi %60, %c7_i32 : i32
      %125 = arith.index_cast %124 : i32 to index
      %126 = memref.load %arg2[%125] : memref<16xi32, #tpu.memory_space<smem>>
      %c0_i32_60 = arith.constant 0 : i32
      %127 = tpu.memref_slice %arg3[%126, %c0_i32_60] : memref<64x128xf32, #tpu.memory_space<any>> -> memref<1x128xf32, #tpu.memory_space<any>>
      %c0_i32_61 = arith.constant 0 : i32
      %c0_i32_62 = arith.constant 0 : i32
      %128 = tpu.memref_slice %arg7[%57, %c0_i32_61, %c0_i32_62] : memref<2x8x128xf32, #tpu.memory_space<vmem>> -> memref<1x8x128xf32, #tpu.memory_space<vmem>>
      %129 = tpu.memref_squeeze %128 : memref<1x8x128xf32, #tpu.memory_space<vmem>> -> memref<8x128xf32, #tpu.memory_space<vmem>>
      %c0_i32_63 = arith.constant 0 : i32
      %130 = tpu.memref_slice %129[%c7_i32, %c0_i32_63] : memref<8x128xf32, #tpu.memory_space<vmem>> -> memref<1x128xf32, #tpu.memory_space<vmem>>
      %131 = tpu.memref_slice %arg8[%57] : memref<2x!tpu.dma_semaphore, #tpu.memory_space<semaphore_mem>> -> memref<1x!tpu.dma_semaphore, #tpu.memory_space<semaphore_mem>>
      %132 = tpu.memref_squeeze %131 : memref<1x!tpu.dma_semaphore, #tpu.memory_space<semaphore_mem>> -> memref<!tpu.dma_semaphore, #tpu.memory_space<semaphore_mem>>
      tpu.enqueue_dma source(%127 : memref<1x128xf32, #tpu.memory_space<any>>) target(%130 : memref<1x128xf32, #tpu.memory_space<vmem>>) target_semaphore(%132 : memref<!tpu.dma_semaphore, #tpu.memory_space<semaphore_mem>>)
      %c8_i32_64 = arith.constant 8 : i32
    } else {
    }
    %c0_i32_8 = arith.constant 0 : i32
    %c0_i32_9 = arith.constant 0 : i32
    %17 = tpu.memref_slice %arg3[%c0_i32_8, %c0_i32_9] : memref<64x128xf32, #tpu.memory_space<any>> -> memref<8x128xf32, #tpu.memory_space<any>>
    %c0_i32_10 = arith.constant 0 : i32
    %c0_i32_11 = arith.constant 0 : i32
    %18 = tpu.memref_slice %arg7[%9, %c0_i32_10, %c0_i32_11] : memref<2x8x128xf32, #tpu.memory_space<vmem>> -> memref<1x8x128xf32, #tpu.memory_space<vmem>>
    %19 = tpu.memref_squeeze %18 : memref<1x8x128xf32, #tpu.memory_space<vmem>> -> memref<8x128xf32, #tpu.memory_space<vmem>>
    %20 = tpu.memref_slice %arg8[%9] : memref<2x!tpu.dma_semaphore, #tpu.memory_space<semaphore_mem>> -> memref<1x!tpu.dma_semaphore, #tpu.memory_space<semaphore_mem>>
    %21 = tpu.memref_squeeze %20 : memref<1x!tpu.dma_semaphore, #tpu.memory_space<semaphore_mem>> -> memref<!tpu.dma_semaphore, #tpu.memory_space<semaphore_mem>>
    tpu.wait_dma2 semaphore(%21 : memref<!tpu.dma_semaphore, #tpu.memory_space<semaphore_mem>>) src(%17 : memref<8x128xf32, #tpu.memory_space<any>>) dst(%19 : memref<8x128xf32, #tpu.memory_space<vmem>>)
    %22 = arith.index_cast %9 : i32 to index
    %c0 = arith.constant 0 : index
    %c0_12 = arith.constant 0 : index
    %23 = vector.load %arg7[%22, %c0, %c0_12] : memref<2x8x128xf32, #tpu.memory_space<vmem>>, vector<1x8x128xf32>
    %24 = vector.shape_cast %23 : vector<1x8x128xf32> to vector<8x128xf32>
    %c0_13 = arith.constant 0 : index
    %c0_14 = arith.constant 0 : index
    %25 = vector.load %arg4[%c0_13, %c0_14] : memref<8x128xf32, #tpu.memory_space<vmem>>, vector<8x128xf32>
    %26 = arith.addf %24, %25 : vector<8x128xf32>
    %cst = arith.constant dense<0.000000e+00> : vector<8xf32>
    %27 = vector.multi_reduction <add>, %26, %cst [1] : vector<8x128xf32> to vector<8xf32>
    %28 = vector.shape_cast %27 : vector<8xf32> to vector<8x1xf32>
    %cst_15 = arith.constant 7.812500e-03 : f32
    %29 = vector.broadcast %cst_15 : f32 to vector<8x1xf32>
    %30 = arith.mulf %28, %29 : vector<8x1xf32>
    %31 = arith.mulf %26, %26 : vector<8x128xf32>
    %cst_16 = arith.constant dense<0.000000e+00> : vector<8xf32>
    %32 = vector.multi_reduction <add>, %31, %cst_16 [1] : vector<8x128xf32> to vector<8xf32>
    %33 = vector.shape_cast %32 : vector<8xf32> to vector<8x1xf32>
    %cst_17 = arith.constant 7.812500e-03 : f32
    %34 = vector.broadcast %cst_17 : f32 to vector<8x1xf32>
    %35 = arith.mulf %33, %34 : vector<8x1xf32>
    %36 = arith.mulf %30, %30 : vector<8x1xf32>
    %37 = arith.subf %35, %36 : vector<8x1xf32>
    %cst_18 = arith.constant 0.000000e+00 : f32
    %38 = vector.broadcast %cst_18 : f32 to vector<8x1xf32>
    %39 = arith.maximumf %37, %38 : vector<8x1xf32>
    %40 = vector.broadcast %30 : vector<8x1xf32> to vector<8x128xf32>
    %41 = arith.subf %26, %40 : vector<8x128xf32>
    %cst_19 = arith.constant 9.99999974E-6 : f32
    %42 = vector.broadcast %cst_19 : f32 to vector<8x1xf32>
    %43 = arith.addf %39, %42 : vector<8x1xf32>
    %44 = math.rsqrt %43 : vector<8x1xf32>
    %45 = vector.broadcast %44 : vector<8x1xf32> to vector<8x128xf32>
    %46 = arith.mulf %41, %45 : vector<8x128xf32>
    %c0_20 = arith.constant 0 : index
    %c0_21 = arith.constant 0 : index
    %47 = vector.load %arg5[%c0_20, %c0_21] : memref<2x128xf32, #tpu.memory_space<vmem>>, vector<1x128xf32>
    %48 = vector.broadcast %47 : vector<1x128xf32> to vector<8x128xf32>
    %49 = arith.mulf %46, %48 : vector<8x128xf32>
    %c1 = arith.constant 1 : index
    %c0_22 = arith.constant 0 : index
    %50 = vector.load %arg5[%c1, %c0_22] : memref<2x128xf32, #tpu.memory_space<vmem>>, vector<1x128xf32>
    %51 = vector.broadcast %50 : vector<1x128xf32> to vector<8x128xf32>
    %52 = arith.addf %49, %51 : vector<8x128xf32>
    %c0_23 = arith.constant 0 : index
    %c0_24 = arith.constant 0 : index
    %c0_25 = arith.constant 0 : index
    %53 = vector.load %arg6[%c0_23, %c0_24, %c0_25] : memref<1x8x128xf32, #tpu.memory_space<vmem>>, vector<1x8x128xf32>
    %54 = vector.shape_cast %53 : vector<1x8x128xf32> to vector<8x128xf32>
    %55 = vector.shape_cast %52 : vector<8x128xf32> to vector<1x8x128xf32>
    tpu.vector_store %arg6[%c0_23, %c0_24, %c0_25], %55 {strides = array<i32>} : memref<1x8x128xf32, #tpu.memory_space<vmem>>, vector<1x8x128xf32>,
    return
  }
  func.func @transform_1(%arg0: i32, %arg1: i32, %arg2: memref<16xi32, #tpu.memory_space<smem>>) -> (i32, i32) {
    %c0_i32 = arith.constant 0 : i32
    %c0_i32_0 = arith.constant 0 : i32
    return %arg0, %c0_i32 : i32, i32
  }
  func.func @transform_2(%arg0: i32, %arg1: i32, %arg2: memref<16xi32, #tpu.memory_space<smem>>) -> (i32, i32) {
    %c0_i32 = arith.constant 0 : i32
    %c0_i32_0 = arith.constant 0 : i32
    %c0_i32_1 = arith.constant 0 : i32
    return %c0_i32, %c0_i32_0 : i32, i32
  }
  func.func @transform_3(%arg0: i32, %arg1: i32, %arg2: memref<16xi32, #tpu.memory_space<smem>>) -> (i32, i32, i32) {
    %c0_i32 = arith.constant 0 : i32
    %c0_i32_0 = arith.constant 0 : i32
    return %arg1, %arg0, %c0_i32 : i32, i32, i32
  }
}

</mosaic_0001>

<bundles_post_ra>
// kernel: tpu_custom_call.1
= control target key start
LH: loop header
LB: loop body
LE: loop exit
PB: predicated region body
PF: predicated region fallthrough
CT: control target
= control target key end

     0   :  { %s2099_s0 = inlined_call_operand.hbm [shape: s32[16], index: 0, kind: input, shape index: {}]   ;;  %s2100_s1 = inlined_call_operand.hbm [shape: f32[64,128], index: 1, kind: input, shape index: {}]   ;;  %s2101_s2 = inlined_call_operand.hbm [shape: f32[8,128], index: 2, kind: input, shape index: {}]   ;;  %s2102_s3 = inlined_call_operand.vmem [shape: f32[2,128], index: 3, kind: input, shape index: {}]   ;;  %s2103_s4 = inlined_call_operand.hbm [shape: f32[2,8,128], index: 4, kind: output, shape index: {}]  }
   0x1   :  { %2121 = sst [smem:[#allocation71_spill]] %s2101_s2  ;;  %s787_s17 = scalar_lea.hbm %s2099_s0, 16 }
   0x2   :  { %2122 = sst [smem:[#allocation72_spill]] %s2102_s3  ;;  %p788_p0 = scmp.ne.s32.totalorder %s2099_s0, %s787_s17 }
   0x3   :  { %2123 = sst [smem:[#allocation73_spill]] %s2103_s4  ;;  %p791_p1 = scmp.lt.u32.totalorder %s787_s17, %s2099_s0 }
   0x5   :  { %p793_p2 = pnand %p791_p1, %p788_p0 }
   0x7   :  { %796 = shalt.err (!%p793_p2)  }
   0x8   :  { %s1361_s22 = smov [#allocation5]  }
   0x9   :  { %10 = dma.hbm_to_smem %s2099_s0, 16, %s1361_s22, [#allocation4] }
   0xa   :  { %1325 = dma.done.wait [#allocation4], 16 }
   0xb   :  { %1326 = vsyncadd [#allocation4], 4294967280 }
   0xc   :  { %12 = sfence }
   0xd   :  { %13 = vsyncpa [#allocation7], 0 }
   0xe   :  { %14 = vsyncpa [#allocation8], 0 }
   0xf   :  { %16 = vsyncpa [#allocation8 + $0x1], 0  ;;  %s1402_s25 = smov 0   ;;  %s1404_s26 = smov 0  }
  0x10   :  { %s1406_s27 = smov 0   ;;  %s1408_s28 = smov 0  }
  0x11   :  { %s1410_s29 = smov 0   ;;  %s1412_s30 = smov 0  }
  0x12 LB: > { %2124 = sst [smem:[#allocation64_spill]] %s1339_s25  ;;  %s623_s0 = sadd.s32 4294967295, %s1359_s30   ;;  %s1359_s30 = sphi %s1412_s30, %s22_s30   ;;  %s1355_s29 = sphi %s1410_s29, %s2154_s29   ;;  %s1351_s28 = sphi %s1408_s28, %s2153_s28   ;;  %s1347_s27 = sphi %s1406_s27, %s2152_s27   ;;  %s1343_s26 = sphi %s1404_s26, %s2156_s26   ;;  %s1339_s25 = sphi %s1402_s25, %s2155_s25  }
  0x13   : > { %2125 = sst [smem:[#allocation65_spill]] %s1347_s27  ;;  %s624_s5 = sadd.s32 4294967294, %s1359_s30  }
  0x14   : > { %2126 = sst [smem:[#allocation66_spill]] %s1355_s29  ;;  %s31_s6 = sadd.s32 1, %s1355_s29 }
  0x15   : > { %2127 = sst [smem:[#allocation67_spill]] %s1359_s30  ;;  %s90_s7 = sadd.s32 1, %s1347_s27 }
  0x16   : > { %p32_p3 = scmp.ge.s32.totalorder %s31_s6, 2  ;;  %p100_p4 = scmp.ne.s32.totalorder %s1347_s27, %s1343_s26 }
  0x17   : > { %p101_p5 = scmp.eq.s32.totalorder %s623_s0, 1  ;;  %p106_p6 = scmp.ne.s32.totalorder %s1343_s26, %s1339_s25 }
  0x18   : > { %s2158_s6 = smov (%p32_p3, %s31_s6), 0  ;;  %p107_p8 = scmp.eq.s32.totalorder %s624_s5, 1 }
  0x19   : > { %2128 = sst [smem:[#allocation68_spill]] %s2158_s6  ;;  %p1442_p7 = por %p101_p5, %p100_p4 }
  0x1a   : > { %s85_s9 = ssub.s32 %s1355_s29, %s2158_s6  ;;  %p625_p9 = scmp.ge.s32.totalorder %s1359_s30, 1 }
  0x1b   : > { %s2129_s8 = scalar_select %p1442_p7, 1, 0 }
  0x1c   : > { %p88_p10 = scmp.eq.s32.totalorder %s85_s9, 0  ;;  %p1449_p11 = por %p107_p8, %p106_p6 }
  0x1d   : > { %p114_p12 = scmp.lt.s32.totalorder %s1359_s30, 3  ;;  %p1461_p0 = scmp.eq.s32.totalorder %s623_s0, 0 }
  0x1e   : > { %s2130_s10 = scalar_select %p1449_p11, 1, 0 }
  0x1f   : > { %s1455_s11 = scalar_select %p88_p10, %s1347_s27, %s90_s7  }
  0x20   : > { %2131 = sst [smem:[#allocation69_spill]] %s2130_s10  ;;  %p1457_p13 = pnand %p625_p9, %p114_p12 }
  0x21   : > { %2132 = sst [smem:[#allocation70_spill]] %s1455_s11  ;;  %s1362_s14 = smov [#allocation6]  }
  0x22   : > { %s2133_s12 = scalar_select %p1457_p13, 1, 0 }
  0x23   : > { %s2134_s13 = scalar_select %p1461_p0, 1, 0 }
  0x24   : > { %p722_p1 = pneg %p1457_p13  ;;  %s129_s15 = sshll.u32 %s1362_s14, 4  ;;  %s130_s15 = int_to_ptr.vmem [resolvable:$true] %s129_s15 }
  0x25   : > { %s2136_s2 = sld [smem:[#allocation71_spill]] }
  0x26   : > { %p1469_p2 = pnand %p1461_p0, %p722_p1 }
  0x28   : > { %p799_p4 = pneg %p1469_p2 }
  0x2b   : > { %s797_s19 = scalar_lea.hbm %s2136_s2, 128 }
  0x2c   : > { %p798_p3 = scmp.ne.s32.totalorder %s2136_s2, %s797_s19  ;;  %p804_p8 = scmp.lt.u32.totalorder %s797_s19, %s2136_s2 }
  0x2e   : > { %p800_p5 = pnand %p799_p4, %p798_p3 }
  0x30   : > { %p801_p6 = pneg %p800_p5 }
  0x32   : > { %p806_p9 = pnand %p804_p8, %p801_p6 }
  0x34   : > { %809 = shalt.err (!%p806_p9)
}
  0x35   : > { %s810_s24 = scalar_lea.vmem %s130_s15, 128  ;;  %p818_p11 = scmp.lt.s32.totalorder %s130_s15, %s130_s15 }
  0x36   : > { %p811_p10 = scmp.ne.s32.totalorder %s130_s15, %s810_s24  ;;  %p819_p7 = scmp.lt.s32.totalorder %s810_s24, %s810_s24 }
  0x38   : > { %p813_p12 = pnand %p811_p10, %p799_p4  ;;  %p820_p0 = por %p819_p7, %p818_p11 }
  0x3a   : > { %p814_p1 = pneg %p813_p12 }
  0x3c   : > { %p821_p13 = pnand %p820_p0, %p814_p1 }
  0x3e   : > { %824 = shalt.err (!%p821_p13)
}
  0x3f   : > { %725 = dma.hbm_to_vmem [thread:$0]  (!%p1469_p2), %s2136_s2, 128, %s130_s15, [#allocation7]  }
  0x40   : > { %p2137_p3 = scmp.ne.s32.totalorder %s2133_s12, 0 }
  0x41   : > { %p2138_p5 = scmp.ne.s32.totalorder (!%p2137_p3), %s2134_s13, 0 }
  0x42   : > { %145 = sbr.rel (%p2137_p3) target bundleno = 696 (0x2b8), region = 28 }
  0x49   : > { %1328 = dma.done.wait (%p2138_p5), [#allocation7], 128  }
  0x4a   : > { %1330 = vsyncadd (%p2138_p5), [#allocation7], 4294967168  ;;  %s2108_s7 = sand.u32 1, %s1343_s26   ;;  %p162_p7 = scmp.lt.s32.totalorder %s1351_s28, 0 }
  0x4b   : > { %s1499_s9 = sshll.u32 %s2108_s7, 3  ;;  %s163_s12 = ssub.s32 0, %s1351_s28 }
  0x4c   : > { %s630_s14 = smin.u32 %s1351_s28, %s163_s12  ;;  %p732_p11 = scmp.eq.s32.totalorder %s1351_s28, 0 }
  0x4d   : > { %s165_s15 = sand.u32 1, %s630_s14   ;;  %s1505_s16 = sshll.u32 %s1351_s28, 3 }
  0x4e   : > { %s166_s13 = ssub.s32 0, %s165_s15  ;;  %s198_s0 = sadd.s32 1, %s1505_s16 }
  0x4f   : > { %s2160_s13 = smov (!%p162_p7, %s166_s13), %s165_s15  ;;  %s2164_s0 = smov (!%p732_p11, %s198_s0), 0 }
  0x50   : > { %p632_p13 = scmp.lt.s32.totalorder %s2160_s13, 0  ;;  %s172_s18 = sadd.s32 2, %s2160_s13 }
  0x51   : > { %s671_s19 = scalar_select %p732_p11, [#allocation5], [#allocation44] }
  0x52   : > { %s2162_s18 = smov (!%p632_p13, %s172_s18), %s2160_s13  ;;  %s214_s15 = sadd.s32 2, %s1505_s16 }
  0x53   : > { %s672_s20 = scalar_select %p732_p11, %s1505_s16, 0 }
  0x54   : > { %s636_s21 = sshll.u32 %s2162_s18, 3  ;;  %s1538_s17 = scalar_lea.sflag [#allocation3], %s2162_s18 }
  0x55   : > { %s181_s22 = sld [smem:[%s671_s19 + %s672_s20]]  ;;  %s1516_s23 = scalar_lea.vmem [#allocation2], %s636_s21 }
  0x56   : > { %s194_s24 = sshll.u32 %s1516_s23, 4  ;;  %s202_s5 = scalar_lea.vmem %s1516_s23, 1 [#allocation2]  ;;  %s1520_s24 = int_to_ptr.vmem [resolvable:$true] %s194_s24 }
  0x57   : > { %s674_s12 = scalar_select %p732_p11, [#allocation5], [#allocation45] }
  0x58   : > { %s210_s14 = sshll.u32 %s202_s5, 4  ;;  %s1547_s5 = scalar_lea.hbm %s2100_s1, 1024  ;;  %s1535_s14 = int_to_ptr.vmem [resolvable:$true] %s210_s14 }
  0x59   : > { %s1528_s7 = sld [smem:[%s674_s12 + %s2164_s0]] }
  0x5b   : > { %s635_s13 = sshll.u32 %s181_s22, 4 }
  0x5c   : > { %s1533_s21 = scalar_lea.hbm %s2100_s1, %s635_s13 }
  0x5d   : > { %s825_s2 = scalar_lea.hbm %s1533_s21, 16  ;;  %p830_p6 = scmp.lt.u32.totalorder %s1533_s21, %s2100_s1 }
  0x5e   : > { %p826_p0 = scmp.ne.s32.totalorder %s1533_s21, %s825_s2  ;;  %p831_p8 = scmp.lt.u32.totalorder %s1547_s5, %s825_s2 }
  0x5f   : > { %p833_p10 = scmp.lt.u32.totalorder %s825_s2, %s1533_s21 }
  0x60   : > { %p827_p2 = pnand %p826_p0, %p732_p11  ;;  %p832_p9 = por %p831_p8, %p830_p6 }
  0x62   : > { %p828_p4 = pneg %p827_p2  ;;  %p834_p12 = por %p833_p10, %p832_p9 }
  0x64   : > { %p835_p1 = pnand %p834_p12, %p828_p4 }
  0x66   : > { %838 = shalt.err (!%p835_p1)  }
  0x67   : > { %s839_s19 = scalar_lea.vmem %s1520_s24, 16  ;;  %s1363_s20 = smov [#allocation2]  }
  0x68   : > { %p840_p3 = scmp.ne.s32.totalorder %s1520_s24, %s839_s19  ;;  %s843_s22 = sshll.u32 %s1363_s20, 4  ;;  %s1559_s22 = int_to_ptr.vmem [resolvable:$false] %s843_s22 }
  0x69   : > { %s1562_s0 = scalar_lea.vmem %s1559_s22, 256  ;;  %p846_p13 = scmp.lt.s32.totalorder %s1520_s24, %s1559_s22 }
  0x6a   : > { %p841_p5 = pnand %p840_p3, %p732_p11  ;;  %p847_p0 = scmp.lt.s32.totalorder %s1562_s0, %s839_s19 }
  0x6c   : > { %p842_p7 = pneg %p841_p5  ;;  %p848_p2 = por %p847_p0, %p846_p13 }
  0x6e   : > { %p849_p4 = pnand %p848_p2, %p842_p7 }
  0x70   : > { %852 = shalt.err (!%p849_p4)  }
  0x71   : > { %673 = dma.hbm_to_vmem [thread:$0]  (%p732_p11), %s1533_s21, 16, %s1520_s24, %s1538_s17 }
  0x72   : > { %s677_s2 = scalar_select %p732_p11, [#allocation5], [#allocation46] }
  0x73   : > { %s2166_s15 = smov (!%p732_p11, %s214_s15), 0  ;;  %s218_s12 = scalar_lea.vmem %s1516_s23, 2 [#allocation2] }
  0x74   : > { %s230_s13 = sadd.s32 3, %s1505_s16  ;;  %s637_s19 = sshll.u32 %s1528_s7, 4 }
  0x75   : > { %s1581_s20 = sld [smem:[%s677_s2 + %s2166_s15]]  ;;  %s201_s11 = scalar_lea.hbm %s2100_s1, %s637_s19 }
  0x76   : > { %s226_s27 = sshll.u32 %s218_s12, 4  ;;  %s853_s10 = scalar_lea.hbm %s201_s11, 16  ;;  %s1603_s27 = int_to_ptr.vmem [resolvable:$true] %s226_s27 }
  0x77   : > { %p854_p6 = scmp.ne.s32.totalorder %s201_s11, %s853_s10  ;;  %p858_p10 = scmp.lt.u32.totalorder %s201_s11, %s2100_s1 }
  0x78   : > { %p859_p12 = scmp.lt.u32.totalorder %s1547_s5, %s853_s10  ;;  %p861_p3 = scmp.lt.u32.totalorder %s853_s10, %s201_s11 }
  0x79   : > { %p855_p8 = pnand %p854_p6, %p732_p11 }
  0x7a   : > { %p860_p1 = por %p859_p12, %p858_p10 }
  0x7b   : > { %p856_p9 = pneg %p855_p8 }
  0x7c   : > { %p862_p5 = por %p861_p3, %p860_p1 }
  0x7e   : > { %p863_p7 = pnand %p862_p5, %p856_p9 }
  0x80   : > { %866 = shalt.err (!%p863_p7)  }
  0x81   : > { %s867_s29 = scalar_lea.vmem %s1535_s14, 16  ;;  %p874_p4 = scmp.lt.s32.totalorder %s1535_s14, %s1559_s22 }
  0x82   : > { %p868_p13 = scmp.ne.s32.totalorder %s1535_s14, %s867_s29  ;;  %p875_p6 = scmp.lt.s32.totalorder %s1562_s0, %s867_s29 }
  0x84   : > { %p869_p0 = pnand %p868_p13, %p732_p11  ;;  %p876_p8 = por %p875_p6, %p874_p4 }
  0x86   : > { %p870_p2 = pneg %p869_p0 }
  0x88   : > { %p877_p10 = pnand %p876_p8, %p870_p2 }
  0x8a   : > { %880 = shalt.err (!%p877_p10)  }
  0x8b   : > { %676 = dma.hbm_to_vmem [thread:$0]  (%p732_p11), %s201_s11, 16, %s1535_s14, %s1538_s17 }
  0x8c   : > { %s234_s6 = scalar_lea.vmem %s1516_s23, 3 [#allocation2]  ;;  %s2168_s13 = smov (!%p732_p11, %s230_s13), 0 }
  0x8d   : > { %s680_s10 = scalar_select %p732_p11, [#allocation5], [#allocation47] }
  0x8e   : > { %s638_s7 = sshll.u32 %s1581_s20, 4  ;;  %s242_s15 = sshll.u32 %s234_s6, 4  ;;  %s1633_s15 = int_to_ptr.vmem [resolvable:$true] %s242_s15 }
  0x8f   : > { %s217_s19 = scalar_lea.hbm %s2100_s1, %s638_s7  ;;  %s1614_s24 = sld [smem:[%s680_s10 + %s2168_s13]] }
  0x90   : > { %s881_s21 = scalar_lea.hbm %s217_s19, 16  ;;  %p886_p3 = scmp.lt.u32.totalorder %s217_s19, %s2100_s1 }
  0x91   : > { %p882_p9 = scmp.ne.s32.totalorder %s217_s19, %s881_s21  ;;  %p887_p5 = scmp.lt.u32.totalorder %s1547_s5, %s881_s21 }
  0x92   : > { %p889_p13 = scmp.lt.u32.totalorder %s881_s21, %s217_s19 }
  0x93   : > { %p883_p12 = pnand %p882_p9, %p732_p11  ;;  %p888_p7 = por %p887_p5, %p886_p3 }
  0x95   : > { %p884_p1 = pneg %p883_p12  ;;  %p890_p0 = por %p889_p13, %p888_p7 }
  0x97   : > { %p891_p2 = pnand %p890_p0, %p884_p1 }
  0x99   : > { %894 = shalt.err (!%p891_p2)  }
  0x9a   : > { %s895_s13 = scalar_lea.vmem %s1603_s27, 16  ;;  %p902_p10 = scmp.lt.s32.totalorder %s1603_s27, %s1559_s22 }
  0x9b   : > { %p896_p4 = scmp.ne.s32.totalorder %s1603_s27, %s895_s13  ;;  %p903_p9 = scmp.lt.s32.totalorder %s1562_s0, %s895_s13 }
  0x9d   : > { %p897_p6 = pnand %p896_p4, %p732_p11  ;;  %p904_p12 = por %p903_p9, %p902_p10 }
  0x9f   : > { %p898_p8 = pneg %p897_p6 }
  0xa1   : > { %p905_p3 = pnand %p904_p12, %p898_p8 }
  0xa3   : > { %908 = shalt.err (!%p905_p3)  }
  0xa4   : > { %679 = dma.hbm_to_vmem [thread:$0]  (%p732_p11), %s217_s19, 16, %s1603_s27, %s1538_s17 }
  0xa5   : > { %s246_s20 = sadd.s32 4, %s1505_s16  ;;  %s250_s6 = scalar_lea.vmem %s1516_s23, 4 [#allocation2] }
  0xa6   : > { %s683_s29 = scalar_select %p732_p11, [#allocation5], [#allocation48] }
  0xa7   : > { %s2170_s20 = smov (!%p732_p11, %s246_s20), 0  ;;  %s262_s10 = sadd.s32 5, %s1505_s16 }
  0xa8   : > { %s639_s7 = sshll.u32 %s1614_s24, 4  ;;  %s1643_s2 = sld [smem:[%s683_s29 + %s2170_s20]] }
  0xa9   : > { %s233_s11 = scalar_lea.hbm %s2100_s1, %s639_s7  ;;  %s258_s14 = sshll.u32 %s250_s6, 4  ;;  %s1665_s14 = int_to_ptr.vmem [resolvable:$true] %s258_s14 }
  0xaa   : > { %s909_s13 = scalar_lea.hbm %s233_s11, 16  ;;  %p914_p13 = scmp.lt.u32.totalorder %s233_s11, %s2100_s1 }
  0xab   : > { %p910_p1 = scmp.ne.s32.totalorder %s233_s11, %s909_s13  ;;  %p915_p0 = scmp.lt.u32.totalorder %s1547_s5, %s909_s13 }
  0xac   : > { %p917_p4 = scmp.lt.u32.totalorder %s909_s13, %s233_s11 }
  0xad   : > { %p911_p5 = pnand %p910_p1, %p732_p11  ;;  %p916_p2 = por %p915_p0, %p914_p13 }
  0xaf   : > { %p912_p7 = pneg %p911_p5  ;;  %p918_p6 = por %p917_p4, %p916_p2 }
  0xb1   : > { %p919_p8 = pnand %p918_p6, %p912_p7 }
  0xb3   : > { %922 = shalt.err (!%p919_p8)  }
  0xb4   : > { %s923_s24 = scalar_lea.vmem %s1633_s15, 16  ;;  %p930_p3 = scmp.lt.s32.totalorder %s1633_s15, %s1559_s22 }
  0xb5   : > { %p924_p10 = scmp.ne.s32.totalorder %s1633_s15, %s923_s24  ;;  %p931_p1 = scmp.lt.s32.totalorder %s1562_s0, %s923_s24 }
  0xb7   : > { %p925_p9 = pnand %p924_p10, %p732_p11  ;;  %p932_p5 = por %p931_p1, %p930_p3 }
  0xb9   : > { %p926_p12 = pneg %p925_p9 }
  0xbb   : > { %p933_p0 = pnand %p932_p5, %p926_p12 }
  0xbd   : > { %936 = shalt.err (!%p933_p0)  }
  0xbe   : > { %682 = dma.hbm_to_vmem [thread:$0]  (%p732_p11), %s233_s11, 16, %s1633_s15, %s1538_s17 }
  0xbf   : > { %s266_s20 = scalar_lea.vmem %s1516_s23, 5 [#allocation2]  ;;  %s2172_s10 = smov (!%p732_p11, %s262_s10), 0 }
  0xc0   : > { %s686_s29 = scalar_select %p732_p11, [#allocation5], [#allocation49] }
  0xc1   : > { %s640_s6 = sshll.u32 %s1643_s2, 4  ;;  %s274_s7 = sshll.u32 %s266_s20, 4  ;;  %s1695_s7 = int_to_ptr.vmem [resolvable:$true] %s274_s7 }
  0xc2   : > { %s249_s13 = scalar_lea.hbm %s2100_s1, %s640_s6  ;;  %s1676_s27 = sld [smem:[%s686_s29 + %s2172_s10]] }
  0xc3   : > { %s937_s19 = scalar_lea.hbm %s249_s13, 16  ;;  %p942_p4 = scmp.lt.u32.totalorder %s249_s13, %s2100_s1 }
  0xc4   : > { %p938_p7 = scmp.ne.s32.totalorder %s249_s13, %s937_s19  ;;  %p943_p6 = scmp.lt.u32.totalorder %s1547_s5, %s937_s19 }
  0xc5   : > { %p945_p10 = scmp.lt.u32.totalorder %s937_s19, %s249_s13 }
  0xc6   : > { %p939_p13 = pnand %p938_p7, %p732_p11  ;;  %p944_p8 = por %p943_p6, %p942_p4 }
  0xc8   : > { %p940_p2 = pneg %p939_p13  ;;  %p946_p9 = por %p945_p10, %p944_p8 }
  0xca   : > { %p947_p12 = pnand %p946_p9, %p940_p2 }
  0xcc   : > { %950 = shalt.err (!%p947_p12)  }
  0xcd   : > { %s951_s10 = scalar_lea.vmem %s1665_s14, 16  ;;  %p958_p0 = scmp.lt.s32.totalorder %s1665_s14, %s1559_s22 }
  0xce   : > { %p952_p3 = scmp.ne.s32.totalorder %s1665_s14, %s951_s10  ;;  %p959_p7 = scmp.lt.s32.totalorder %s1562_s0, %s951_s10 }
  0xd0   : > { %p953_p1 = pnand %p952_p3, %p732_p11  ;;  %p960_p13 = por %p959_p7, %p958_p0 }
  0xd2   : > { %p954_p5 = pneg %p953_p1 }
  0xd4   : > { %p961_p4 = pnand %p960_p13, %p954_p5 }
  0xd6   : > { %964 = shalt.err (!%p961_p4)  }
  0xd7   : > { %685 = dma.hbm_to_vmem [thread:$0]  (%p732_p11), %s249_s13, 16, %s1665_s14, %s1538_s17 }
  0xd8   : > { %s278_s2 = sadd.s32 6, %s1505_s16  ;;  %s282_s20 = scalar_lea.vmem %s1516_s23, 6 [#allocation2] }
  0xd9   : > { %s689_s24 = scalar_select %p732_p11, [#allocation5], [#allocation50] }
  0xda   : > { %s2174_s2 = smov (!%p732_p11, %s278_s2), 0  ;;  %s294_s29 = sadd.s32 7, %s1505_s16 }
  0xdb   : > { %s641_s6 = sshll.u32 %s1676_s27, 4  ;;  %s1705_s12 = sld [smem:[%s689_s24 + %s2174_s2]] }
  0xdc   : > { %s265_s15 = scalar_lea.hbm %s2100_s1, %s641_s6  ;;  %s290_s11 = sshll.u32 %s282_s20, 4  ;;  %s1727_s11 = int_to_ptr.vmem [resolvable:$true] %s290_s11 }
  0xdd   : > { %s965_s10 = scalar_lea.hbm %s265_s15, 16  ;;  %p970_p10 = scmp.lt.u32.totalorder %s265_s15, %s2100_s1 }
  0xde   : > { %p966_p2 = scmp.ne.s32.totalorder %s265_s15, %s965_s10  ;;  %p971_p9 = scmp.lt.u32.totalorder %s1547_s5, %s965_s10 }
  0xdf   : > { %p973_p3 = scmp.lt.u32.totalorder %s965_s10, %s265_s15 }
  0xe0   : > { %p967_p6 = pnand %p966_p2, %p732_p11  ;;  %p972_p12 = por %p971_p9, %p970_p10 }
  0xe2   : > { %p968_p8 = pneg %p967_p6  ;;  %p974_p1 = por %p973_p3, %p972_p12 }
  0xe4   : > { %p975_p5 = pnand %p974_p1, %p968_p8 }
  0xe6   : > { %978 = shalt.err (!%p975_p5)  }
  0xe7   : > { %s979_s27 = scalar_lea.vmem %s1695_s7, 16  ;;  %p986_p4 = scmp.lt.s32.totalorder %s1695_s7, %s1559_s22 }
  0xe8   : > { %p980_p0 = scmp.ne.s32.totalorder %s1695_s7, %s979_s27  ;;  %p987_p2 = scmp.lt.s32.totalorder %s1562_s0, %s979_s27 }
  0xea   : > { %p981_p7 = pnand %p980_p0, %p732_p11  ;;  %p988_p6 = por %p987_p2, %p986_p4 }
  0xec   : > { %p982_p13 = pneg %p981_p7 }
  0xee   : > { %p989_p9 = pnand %p988_p6, %p982_p13 }
  0xf0   : > { %992 = shalt.err (!%p989_p9)  }
  0xf1   : > { %688 = dma.hbm_to_vmem [thread:$0]  (%p732_p11), %s265_s15, 16, %s1695_s7, %s1538_s17 }
  0xf2   : > { %s298_s2 = scalar_lea.vmem %s1516_s23, 7 [#allocation2]  ;;  %s2176_s29 = smov (!%p732_p11, %s294_s29), 0 }
  0xf3   : > { %s692_s24 = scalar_select %p732_p11, [#allocation5], [#allocation51] }
  0xf4   : > { %s642_s20 = sshll.u32 %s1705_s12, 4  ;;  %s306_s6 = sshll.u32 %s298_s2, 4  ;;  %s1757_s6 = int_to_ptr.vmem [resolvable:$true] %s306_s6 }
  0xf5   : > { %s281_s10 = scalar_lea.hbm %s2100_s1, %s642_s20  ;;  %s1738_s14 = sld [smem:[%s692_s24 + %s2176_s29]] }
  0xf6   : > { %s993_s13 = scalar_lea.hbm %s281_s10, 16  ;;  %p998_p3 = scmp.lt.u32.totalorder %s281_s10, %s2100_s1 }
  0xf7   : > { %p994_p8 = scmp.ne.s32.totalorder %s281_s10, %s993_s13  ;;  %p999_p1 = scmp.lt.u32.totalorder %s1547_s5, %s993_s13 }
  0xf8   : > { %p1001_p0 = scmp.lt.u32.totalorder %s993_s13, %s281_s10 }
  0xf9   : > { %p995_p10 = pnand %p994_p8, %p732_p11  ;;  %p1000_p5 = por %p999_p1, %p998_p3 }
  0xfb   : > { %p996_p12 = pneg %p995_p10  ;;  %p1002_p7 = por %p1001_p0, %p1000_p5 }
  0xfd   : > { %p1003_p13 = pnand %p1002_p7, %p996_p12 }
  0xff   : > { %1006 = shalt.err (!%p1003_p13)  }
 0x100   : > { %s1007_s29 = scalar_lea.vmem %s1727_s11, 16  ;;  %p1014_p9 = scmp.lt.s32.totalorder %s1727_s11, %s1559_s22 }
 0x101   : > { %p1008_p4 = scmp.ne.s32.totalorder %s1727_s11, %s1007_s29  ;;  %p1015_p8 = scmp.lt.s32.totalorder %s1562_s0, %s1007_s29 }
 0x103   : > { %p1009_p2 = pnand %p1008_p4, %p732_p11  ;;  %p1016_p10 = por %p1015_p8, %p1014_p9 }
 0x105   : > { %p1010_p6 = pneg %p1009_p2 }
 0x107   : > { %p1017_p1 = pnand %p1016_p10, %p1010_p6 }
 0x109   : > { %1020 = shalt.err (!%p1017_p1)  }
 0x10a   : > { %691 = dma.hbm_to_vmem [thread:$0]  (%p732_p11), %s281_s10, 16, %s1727_s11, %s1538_s17 }
 0x10b   : > { %s2139_s12 = sadd.s32 1, %s1351_s28  ;;  %s2115_s2 = ssub.s32 1, %s2162_s18 }
 0x10c   : > { %p1761_p12 = scmp.lt.s32.totalorder %s2139_s12, 2  ;;  %s1767_s24 = sadd.s32 8, %s1505_s16 }
 0x10d   : > { %s647_s20 = sshll.u32 %s2115_s2, 3  ;;  %s643_s19 = sshll.u32 %s1738_s14, 4 }
 0x10e   : > { %s2140_s27 = scalar_select %p1761_p12, 1, 0 }
 0x10f   : > { %s696_s21 = scalar_select %p1761_p12, [#allocation5], [#allocation52] }
 0x110   : > { %s297_s11 = scalar_lea.hbm %s2100_s1, %s643_s19 }
 0x111   : > { %s1021_s10 = scalar_lea.hbm %s297_s11, 16  ;;  %p1026_p7 = scmp.lt.u32.totalorder %s297_s11, %s2100_s1 }
 0x112   : > { %p1022_p3 = scmp.ne.s32.totalorder %s297_s11, %s1021_s10  ;;  %p1027_p13 = scmp.lt.u32.totalorder %s1547_s5, %s1021_s10 }
 0x113   : > { %p1029_p2 = scmp.lt.u32.totalorder %s1021_s10, %s297_s11 }
 0x114   : > { %p1023_p5 = pnand %p1022_p3, %p732_p11  ;;  %p1028_p4 = por %p1027_p13, %p1026_p7 }
 0x116   : > { %p1024_p0 = pneg %p1023_p5  ;;  %p1030_p6 = por %p1029_p2, %p1028_p4 }
 0x118   : > { %p1031_p9 = pnand %p1030_p6, %p1024_p0 }
 0x11a   : > { %1034 = shalt.err (!%p1031_p9)  }
 0x11b   : > { %s1035_s16 = scalar_lea.vmem %s1757_s6, 16  ;;  %p1042_p3 = scmp.lt.s32.totalorder %s1757_s6, %s1559_s22 }
 0x11c   : > { %p1036_p8 = scmp.ne.s32.totalorder %s1757_s6, %s1035_s16  ;;  %p1043_p5 = scmp.lt.s32.totalorder %s1562_s0, %s1035_s16 }
 0x11e   : > { %p1037_p10 = pnand %p1036_p8, %p732_p11  ;;  %p1044_p12 = por %p1043_p5, %p1042_p3 }
 0x120   : > { %p1038_p1 = pneg %p1037_p10 }
 0x122   : > { %p1045_p7 = pnand %p1044_p12, %p1038_p1 }
 0x124   : > { %1048 = shalt.err (!%p1045_p7)  }
 0x125   : > { %694 = dma.hbm_to_vmem [thread:$0]  (%p732_p11), %s297_s11, 16, %s1757_s6, %s1538_s17 }
 0x126   : > { %p2141_p0 = scmp.ne.s32.totalorder %s2140_s27, 0  ;;  %s1797_s12 = scalar_lea.vmem [#allocation2], %s647_s20 }
 0x127   : > { %s332_s19 = sshll.u32 %s1797_s12, 4  ;;  %s336_s13 = sadd.s32 1, %s1767_s24  ;;  %s1801_s19 = int_to_ptr.vmem [resolvable:$true] %s332_s19 }
 0x128   : > { %s697_s14 = scalar_select %p2141_p0, %s1767_s24, 0 }
 0x129   : > { %s699_s10 = scalar_select %p2141_p0, [#allocation5], [#allocation53] }
 0x12a   : > { %s319_s7 = sld [smem:[%s696_s21 + %s697_s14]]  ;;  %s2178_s13 = smov (!%p2141_p0, %s336_s13), 0 }
 0x12b   : > { %s340_s15 = scalar_lea.vmem %s1797_s12, 1 [#allocation2]  ;;  %s352_s6 = sadd.s32 2, %s1767_s24 }
 0x12c   : > { %s1809_s11 = sld [smem:[%s699_s10 + %s2178_s13]]  ;;  %s348_s20 = sshll.u32 %s340_s15, 4  ;;  %s1811_s20 = int_to_ptr.vmem [resolvable:$true] %s348_s20 }
 0x12d   : > { %s356_s29 = scalar_lea.vmem %s1797_s12, 2 [#allocation2]  ;;  %s2142_s30 = ssub.s32 1, %s2162_s18 }
 0x12e   : > { %s364_s2 = sshll.u32 %s356_s29, 4  ;;  %s1821_s4 = scalar_lea.sflag [#allocation3], %s2142_s30  ;;  %s1817_s2 = int_to_ptr.vmem [resolvable:$true] %s364_s2 }
 0x130   : > { %s646_s16 = sshll.u32 %s319_s7, 4 }
 0x131   : > { %s321_s14 = scalar_lea.hbm %s2100_s1, %s646_s16 }
 0x132   : > { %s1049_s3 = scalar_lea.hbm %s321_s14, 16  ;;  %p1054_p4 = scmp.lt.u32.totalorder %s321_s14, %s2100_s1 }
 0x133   : > { %p1050_p11 = scmp.ne.s32.totalorder %s321_s14, %s1049_s3  ;;  %p1055_p2 = scmp.lt.u32.totalorder %s1547_s5, %s1049_s3 }
 0x134   : > { %p1057_p9 = scmp.lt.u32.totalorder %s1049_s3, %s321_s14 }
 0x135   : > { %p1051_p12 = pnand %p1050_p11, %p2141_p0  ;;  %p1056_p6 = por %p1055_p2, %p1054_p4 }
 0x137   : > { %p1052_p13 = pneg %p1051_p12  ;;  %p1058_p8 = por %p1057_p9, %p1056_p6 }
 0x139   : > { %p1059_p10 = pnand %p1058_p8, %p1052_p13 }
 0x13b   : > { %1062 = shalt.err (!%p1059_p10)  }
 0x13c   : > { %s1063_s25 = scalar_lea.vmem %s1801_s19, 16  ;;  %p1070_p7 = scmp.lt.s32.totalorder %s1801_s19, %s1559_s22 }
 0x13d   : > { %p1064_p1 = scmp.ne.s32.totalorder %s1801_s19, %s1063_s25  ;;  %p1071_p11 = scmp.lt.s32.totalorder %s1562_s0, %s1063_s25 }
 0x13f   : > { %p1065_p3 = pnand %p1064_p1, %p2141_p0  ;;  %p1072_p12 = por %p1071_p11, %p1070_p7 }
 0x141   : > { %p1066_p5 = pneg %p1065_p3 }
 0x143   : > { %p1073_p2 = pnand %p1072_p12, %p1066_p5 }
 0x145   : > { %1076 = shalt.err (!%p1073_p2)  }
 0x146   : > { %698 = dma.hbm_to_vmem [thread:$0]  (%p2141_p0), %s321_s14, 16, %s1801_s19, %s1821_s4 }
 0x147   : > { %s702_s3 = scalar_select %p2141_p0, [#allocation5], [#allocation54] }
 0x148   : > { %s648_s30 = sshll.u32 %s1809_s11, 4  ;;  %s368_s18 = sadd.s32 3, %s1767_s24 }
 0x149   : > { %s339_s29 = scalar_lea.hbm %s2100_s1, %s648_s30  ;;  %s372_s16 = scalar_lea.vmem %s1797_s12, 3 [#allocation2] }
 0x14a   : > { %s1077_s21 = scalar_lea.hbm %s339_s29, 16  ;;  %p1082_p9 = scmp.lt.u32.totalorder %s339_s29, %s2100_s1 }
 0x14b   : > { %p1078_p13 = scmp.ne.s32.totalorder %s339_s29, %s1077_s21  ;;  %p1083_p8 = scmp.lt.u32.totalorder %s1547_s5, %s1077_s21 }
 0x14c   : > { %p1085_p1 = scmp.lt.u32.totalorder %s1077_s21, %s339_s29 }
 0x14d   : > { %p1079_p4 = pnand %p1078_p13, %p2141_p0  ;;  %p1084_p10 = por %p1083_p8, %p1082_p9 }
 0x14f   : > { %p1080_p6 = pneg %p1079_p4  ;;  %p1086_p3 = por %p1085_p1, %p1084_p10 }
 0x151   : > { %p1087_p5 = pnand %p1086_p3, %p1080_p6 }
 0x153   : > { %1090 = shalt.err (!%p1087_p5)  }
 0x154   : > { %s1091_s19 = scalar_lea.vmem %s1811_s20, 16  ;;  %p1098_p2 = scmp.lt.s32.totalorder %s1811_s20, %s1559_s22 }
 0x155   : > { %p1092_p7 = scmp.ne.s32.totalorder %s1811_s20, %s1091_s19  ;;  %p1099_p13 = scmp.lt.s32.totalorder %s1562_s0, %s1091_s19 }
 0x157   : > { %p1093_p11 = pnand %p1092_p7, %p2141_p0  ;;  %p1100_p4 = por %p1099_p13, %p1098_p2 }
 0x159   : > { %p1094_p12 = pneg %p1093_p11 }
 0x15b   : > { %p1101_p8 = pnand %p1100_p4, %p1094_p12 }
 0x15d   : > { %1104 = shalt.err (!%p1101_p8)  }
 0x15e   : > { %701 = dma.hbm_to_vmem [thread:$0]  (%p2141_p0), %s339_s29, 16, %s1811_s20, %s1821_s4 }
 0x15f   : > { %s2180_s6 = smov (!%p2141_p0, %s352_s6), 0  ;;  %s380_s25 = sshll.u32 %s372_s16, 4  ;;  %s1873_s25 = int_to_ptr.vmem [resolvable:$true] %s380_s25 }
 0x160   : > { %s705_s11 = scalar_select %p2141_p0, [#allocation5], [#allocation55] }
 0x161   : > { %s353_s14 = sld [smem:[%s702_s3 + %s2180_s6]]  ;;  %s2182_s18 = smov (!%p2141_p0, %s368_s18), 0 }
 0x162   : > { %s384_s30 = sadd.s32 4, %s1767_s24  ;;  %s1876_s7 = sld [smem:[%s705_s11 + %s2182_s18]] }
 0x163   : > { %s388_s15 = scalar_lea.vmem %s1797_s12, 4 [#allocation2]  ;;  %s2184_s30 = smov (!%p2141_p0, %s384_s30), 0 }
 0x164   : > { %s708_s21 = scalar_select %p2141_p0, [#allocation5], [#allocation56] }
 0x165   : > { %s396_s29 = sshll.u32 %s388_s15, 4  ;;  %s1909_s29 = int_to_ptr.vmem [resolvable:$true] %s396_s29 }
 0x166   : > { %s1886_s3 = sld [smem:[%s708_s21 + %s2184_s30]] }
 0x167   : > { %s649_s20 = sshll.u32 %s353_s14, 4 }
 0x168   : > { %s355_s6 = scalar_lea.hbm %s2100_s1, %s649_s20 }
 0x169   : > { %s1105_s16 = scalar_lea.hbm %s355_s6, 16  ;;  %p1110_p1 = scmp.lt.u32.totalorder %s355_s6, %s2100_s1 }
 0x16a   : > { %p1106_p6 = scmp.ne.s32.totalorder %s355_s6, %s1105_s16  ;;  %p1111_p3 = scmp.lt.u32.totalorder %s1547_s5, %s1105_s16 }
 0x16b   : > { %p1113_p7 = scmp.lt.u32.totalorder %s1105_s16, %s355_s6 }
 0x16c   : > { %p1107_p9 = pnand %p1106_p6, %p2141_p0  ;;  %p1112_p5 = por %p1111_p3, %p1110_p1 }
 0x16e   : > { %p1108_p10 = pneg %p1107_p9  ;;  %p1114_p11 = por %p1113_p7, %p1112_p5 }
 0x170   : > { %p1115_p12 = pnand %p1114_p11, %p1108_p10 }
 0x172   : > { %1118 = shalt.err (!%p1115_p12)  }
 0x173   : > { %s1119_s11 = scalar_lea.vmem %s1817_s2, 16  ;;  %p1126_p8 = scmp.lt.s32.totalorder %s1817_s2, %s1559_s22 }
 0x174   : > { %p1120_p2 = scmp.ne.s32.totalorder %s1817_s2, %s1119_s11  ;;  %p1127_p6 = scmp.lt.s32.totalorder %s1562_s0, %s1119_s11 }
 0x176   : > { %p1121_p13 = pnand %p1120_p2, %p2141_p0  ;;  %p1128_p9 = por %p1127_p6, %p1126_p8 }
 0x178   : > { %p1122_p4 = pneg %p1121_p13 }
 0x17a   : > { %p1129_p1 = pnand %p1128_p9, %p1122_p4 }
 0x17c   : > { %1132 = shalt.err (!%p1129_p1)  }
 0x17d   : > { %704 = dma.hbm_to_vmem [thread:$0]  (%p2141_p0), %s355_s6, 16, %s1817_s2, %s1821_s4 }
 0x17e   : > { %s650_s14 = sshll.u32 %s1876_s7, 4 }
 0x17f   : > { %s371_s21 = scalar_lea.hbm %s2100_s1, %s650_s14 }
 0x180   : > { %s1133_s20 = scalar_lea.hbm %s371_s21, 16  ;;  %p1138_p7 = scmp.lt.u32.totalorder %s371_s21, %s2100_s1 }
 0x181   : > { %p1134_p10 = scmp.ne.s32.totalorder %s371_s21, %s1133_s20  ;;  %p1139_p11 = scmp.lt.u32.totalorder %s1547_s5, %s1133_s20 }
 0x182   : > { %p1141_p2 = scmp.lt.u32.totalorder %s1133_s20, %s371_s21 }
 0x183   : > { %p1135_p3 = pnand %p1134_p10, %p2141_p0  ;;  %p1140_p12 = por %p1139_p11, %p1138_p7 }
 0x185   : > { %p1136_p5 = pneg %p1135_p3  ;;  %p1142_p13 = por %p1141_p2, %p1140_p12 }
 0x187   : > { %p1143_p4 = pnand %p1142_p13, %p1136_p5 }
 0x189   : > { %1146 = shalt.err (!%p1143_p4)  }
 0x18a   : > { %s1147_s2 = scalar_lea.vmem %s1873_s25, 16  ;;  %p1154_p1 = scmp.lt.s32.totalorder %s1873_s25, %s1559_s22 }
 0x18b   : > { %p1148_p8 = scmp.ne.s32.totalorder %s1873_s25, %s1147_s2  ;;  %p1155_p10 = scmp.lt.s32.totalorder %s1562_s0, %s1147_s2 }
 0x18d   : > { %p1149_p6 = pnand %p1148_p8, %p2141_p0  ;;  %p1156_p3 = por %p1155_p10, %p1154_p1 }
 0x18f   : > { %p1150_p9 = pneg %p1149_p6 }
 0x191   : > { %p1157_p7 = pnand %p1156_p3, %p1150_p9 }
 0x193   : > { %1160 = shalt.err (!%p1157_p7)  }
 0x194   : > { %707 = dma.hbm_to_vmem [thread:$0]  (%p2141_p0), %s371_s21, 16, %s1873_s25, %s1821_s4 }
 0x195   : > { %s711_s7 = scalar_select %p2141_p0, [#allocation5], [#allocation57] }
 0x196   : > { %s651_s6 = sshll.u32 %s1886_s3, 4  ;;  %s400_s16 = sadd.s32 5, %s1767_s24 }
 0x197   : > { %s387_s11 = scalar_lea.hbm %s2100_s1, %s651_s6  ;;  %s404_s14 = scalar_lea.vmem %s1797_s12, 5 [#allocation2] }
 0x198   : > { %s1161_s30 = scalar_lea.hbm %s387_s11, 16  ;;  %p1166_p2 = scmp.lt.u32.totalorder %s387_s11, %s2100_s1 }
 0x199   : > { %p1162_p5 = scmp.ne.s32.totalorder %s387_s11, %s1161_s30  ;;  %p1167_p13 = scmp.lt.u32.totalorder %s1547_s5, %s1161_s30 }
 0x19a   : > { %p1169_p8 = scmp.lt.u32.totalorder %s1161_s30, %s387_s11 }
 0x19b   : > { %p1163_p11 = pnand %p1162_p5, %p2141_p0  ;;  %p1168_p4 = por %p1167_p13, %p1166_p2 }
 0x19d   : > { %p1164_p12 = pneg %p1163_p11  ;;  %p1170_p6 = por %p1169_p8, %p1168_p4 }
 0x19f   : > { %p1171_p9 = pnand %p1170_p6, %p1164_p12 }
 0x1a1   : > { %1174 = shalt.err (!%p1171_p9)  }
 0x1a2   : > { %s1175_s25 = scalar_lea.vmem %s1909_s29, 16  ;;  %p1182_p7 = scmp.lt.s32.totalorder %s1909_s29, %s1559_s22 }
 0x1a3   : > { %p1176_p1 = scmp.ne.s32.totalorder %s1909_s29, %s1175_s25  ;;  %p1183_p5 = scmp.lt.s32.totalorder %s1562_s0, %s1175_s25 }
 0x1a5   : > { %p1177_p10 = pnand %p1176_p1, %p2141_p0  ;;  %p1184_p11 = por %p1183_p5, %p1182_p7 }
 0x1a7   : > { %p1178_p3 = pneg %p1177_p10 }
 0x1a9   : > { %p1185_p2 = pnand %p1184_p11, %p1178_p3 }
 0x1ab   : > { %1188 = shalt.err (!%p1185_p2)  }
 0x1ac   : > { %710 = dma.hbm_to_vmem [thread:$0]  (%p2141_p0), %s387_s11, 16, %s1909_s29, %s1821_s4 }
 0x1ad   : > { %s2186_s16 = smov (!%p2141_p0, %s400_s16), 0  ;;  %s412_s3 = sshll.u32 %s404_s14, 4  ;;  %s1964_s3 = int_to_ptr.vmem [resolvable:$true] %s412_s3 }
 0x1ae   : > { %s416_s21 = sadd.s32 6, %s1767_s24  ;;  %s401_s13 = sld [smem:[%s711_s7 + %s2186_s16]] }
 0x1af   : > { %s420_s10 = scalar_lea.vmem %s1797_s12, 6 [#allocation2]  ;;  %s2188_s21 = smov (!%p2141_p0, %s416_s21), 0 }
 0x1b0   : > { %s714_s2 = scalar_select %p2141_p0, [#allocation5], [#allocation58] }
 0x1b1   : > { %s428_s18 = sshll.u32 %s420_s10, 4  ;;  %s432_s11 = sadd.s32 7, %s1767_s24  ;;  %s1974_s18 = int_to_ptr.vmem [resolvable:$true] %s428_s18 }
 0x1b2   : > { %s1966_s6 = sld [smem:[%s714_s2 + %s2188_s21]] }
 0x1b3   : > { %s717_s29 = scalar_select %p2141_p0, [#allocation5], [#allocation59] }
 0x1b4   : > { %s652_s19 = sshll.u32 %s401_s13, 4 }
 0x1b5   : > { %s403_s15 = scalar_lea.hbm %s2100_s1, %s652_s19 }
 0x1b6   : > { %s1189_s7 = scalar_lea.hbm %s403_s15, 16  ;;  %p1194_p8 = scmp.lt.u32.totalorder %s403_s15, %s2100_s1 }
 0x1b7   : > { %p1190_p12 = scmp.ne.s32.totalorder %s403_s15, %s1189_s7  ;;  %p1195_p6 = scmp.lt.u32.totalorder %s1547_s5, %s1189_s7 }
 0x1b8   : > { %p1197_p1 = scmp.lt.u32.totalorder %s1189_s7, %s403_s15 }
 0x1b9   : > { %p1191_p13 = pnand %p1190_p12, %p2141_p0  ;;  %p1196_p9 = por %p1195_p6, %p1194_p8 }
 0x1bb   : > { %p1192_p4 = pneg %p1191_p13  ;;  %p1198_p10 = por %p1197_p1, %p1196_p9 }
 0x1bd   : > { %p1199_p3 = pnand %p1198_p10, %p1192_p4 }
 0x1bf   : > { %1202 = shalt.err (!%p1199_p3)  }
 0x1c0   : > { %s1203_s24 = scalar_lea.vmem %s1964_s3, 16  ;;  %p1210_p2 = scmp.lt.s32.totalorder %s1964_s3, %s1559_s22 }
 0x1c1   : > { %p1204_p7 = scmp.ne.s32.totalorder %s1964_s3, %s1203_s24  ;;  %p1211_p12 = scmp.lt.s32.totalorder %s1562_s0, %s1203_s24 }
 0x1c3   : > { %p1205_p5 = pnand %p1204_p7, %p2141_p0  ;;  %p1212_p13 = por %p1211_p12, %p1210_p2 }
 0x1c5   : > { %p1206_p11 = pneg %p1205_p5 }
 0x1c7   : > { %p1213_p6 = pnand %p1212_p13, %p1206_p11 }
 0x1c9   : > { %1216 = shalt.err (!%p1213_p6)  }
 0x1ca   : > { %713 = dma.hbm_to_vmem [thread:$0]  (%p2141_p0), %s403_s15, 16, %s1964_s3, %s1821_s4 }
 0x1cb   : > { %s2190_s11 = smov (!%p2141_p0, %s432_s11), 0  ;;  %s653_s25 = sshll.u32 %s1966_s6, 4 }
 0x1cc   : > { %s436_s21 = scalar_lea.vmem %s1797_s12, 7 [#allocation2]  ;;  %s419_s2 = scalar_lea.hbm %s2100_s1, %s653_s25 }
 0x1cd   : > { %s433_s19 = sld [smem:[%s717_s29 + %s2190_s11]]  ;;  %s1217_s14 = scalar_lea.hbm %s419_s2, 16 }
 0x1ce   : > { %p1218_p4 = scmp.ne.s32.totalorder %s419_s2, %s1217_s14  ;;  %p1222_p1 = scmp.lt.u32.totalorder %s419_s2, %s2100_s1 }
 0x1cf   : > { %p1223_p10 = scmp.lt.u32.totalorder %s1547_s5, %s1217_s14  ;;  %p1225_p7 = scmp.lt.u32.totalorder %s1217_s14, %s419_s2 }
 0x1d0   : > { %p1219_p8 = pnand %p1218_p4, %p2141_p0 }
 0x1d1   : > { %p1224_p3 = por %p1223_p10, %p1222_p1 }
 0x1d2   : > { %p1220_p9 = pneg %p1219_p8 }
 0x1d3   : > { %p1226_p5 = por %p1225_p7, %p1224_p3 }
 0x1d5   : > { %p1227_p11 = pnand %p1226_p5, %p1220_p9 }
 0x1d7   : > { %1230 = shalt.err (!%p1227_p11)  }
 0x1d8   : > { %s1231_s12 = scalar_lea.vmem %s1974_s18, 16  ;;  %p1238_p6 = scmp.lt.s32.totalorder %s1974_s18, %s1559_s22 }
 0x1d9   : > { %p1232_p2 = scmp.ne.s32.totalorder %s1974_s18, %s1231_s12  ;;  %p1239_p4 = scmp.lt.s32.totalorder %s1562_s0, %s1231_s12 }
 0x1db   : > { %p1233_p12 = pnand %p1232_p2, %p2141_p0  ;;  %p1240_p8 = por %p1239_p4, %p1238_p6 }
 0x1dd   : > { %p1234_p13 = pneg %p1233_p12 }
 0x1df   : > { %p1241_p1 = pnand %p1240_p8, %p1234_p13 }
 0x1e1   : > { %1244 = shalt.err (!%p1241_p1)  }
 0x1e2   : > { %716 = dma.hbm_to_vmem [thread:$0]  (%p2141_p0), %s419_s2, 16, %s1974_s18, %s1821_s4 }
 0x1e3   : > { %s444_s3 = sshll.u32 %s436_s21, 4  ;;  %s654_s6 = sshll.u32 %s433_s19, 4  ;;  %s445_s3 = int_to_ptr.vmem [resolvable:$true] %s444_s3 }
 0x1e4   : > { %s435_s15 = scalar_lea.hbm %s2100_s1, %s654_s6 }
 0x1e5   : > { %s1245_s16 = scalar_lea.hbm %s435_s15, 16  ;;  %p1250_p7 = scmp.lt.u32.totalorder %s435_s15, %s2100_s1 }
 0x1e6   : > { %p1246_p9 = scmp.ne.s32.totalorder %s435_s15, %s1245_s16  ;;  %p1251_p5 = scmp.lt.u32.totalorder %s1547_s5, %s1245_s16 }
 0x1e7   : > { %p1253_p2 = scmp.lt.u32.totalorder %s1245_s16, %s435_s15 }
 0x1e8   : > { %p1247_p10 = pnand %p1246_p9, %p2141_p0  ;;  %p1252_p11 = por %p1251_p5, %p1250_p7 }
 0x1ea   : > { %p1248_p3 = pneg %p1247_p10  ;;  %p1254_p12 = por %p1253_p2, %p1252_p11 }
 0x1ec   : > { %p1255_p13 = pnand %p1254_p12, %p1248_p3 }
 0x1ee   : > { %1258 = shalt.err (!%p1255_p13)  }
 0x1ef   : > { %s1259_s18 = scalar_lea.vmem %s445_s3, 16  ;;  %p1266_p1 = scmp.lt.s32.totalorder %s445_s3, %s1559_s22 }
 0x1f0   : > { %p1260_p6 = scmp.ne.s32.totalorder %s445_s3, %s1259_s18  ;;  %p1267_p9 = scmp.lt.s32.totalorder %s1562_s0, %s1259_s18 }
 0x1f2   : > { %p1261_p4 = pnand %p1260_p6, %p2141_p0  ;;  %p1268_p10 = por %p1267_p9, %p1266_p1 }
 0x1f4   : > { %p1262_p8 = pneg %p1261_p4 }
 0x1f6   : > { %p1269_p5 = pnand %p1268_p10, %p1262_p8 }
 0x1f8   : > { %1272 = shalt.err (!%p1269_p5)  }
 0x1f9   : > { %719 = dma.hbm_to_vmem [thread:$0]  (%p2141_p0), %s435_s15, 16, %s445_s3, %s1821_s4 }
 0x1fa   : > { %s161_s5 = scalar_lea.vmem [#allocation9], %s1499_s9 }
 0x1fb   : > { %1331 = dma.done.wait %s1538_s17, 128 }
 0x1fc   : > { %1332 = vsyncadd %s1538_s17, 4294967168  ;;  %v454_v0 = vld [vmem:[%s1516_s23] sm:$0xff]  ;;  %v455_v1 = vld [vmem:[#allocation6] sm:$0xff]  ;;  %s2143_s17 = sld [smem:[#allocation72_spill]]  ;;  %s659_s0 = sshll.u32 %s1351_s28, 7 }
 0x1fd   : > { %v456_v2 = vadd.f32 %v455_v1, %v454_v0  ;;  %s499_s27 = sshll.u32 %s161_s5, 4  ;;  %s2144_s13 = sld [smem:[#allocation73_spill]]  ;;  %s2052_s27 = int_to_ptr.vmem [resolvable:$true] %s499_s27 }
 0x1fe   : > { %s2145_s2 = sand.u32 1, %s1343_s26   ;;  %s1273_s14 = scalar_lea.vmem %s2052_s27, 128 }
 0x1ff   : > { %457 = vadd.xlane.f32.xlu0 %v456_v2  ;;  %v460_v3 = vmul.f32 %v456_v2, %v456_v2  ;;  %s485_s19 = scalar_lea.sflag [#allocation8], %s2145_s2  ;;  %p1274_p0 = scmp.ne.s32.totalorder %s2052_s27, %s1273_s14 }
 0x200   : > { %p2146_p3 = scmp.ne.s32.totalorder %s2129_s8, 0  ;;  %s1364_s28 = smov [#allocation9]  }
 0x201   : > { %s1277_s30 = sshll.u32 %s1364_s28, 4  ;;  %s1278_s30 = int_to_ptr.vmem [resolvable:$false] %s1277_s30 }
 0x202   : > { %v656_v14 = vld [vmem:[%s2143_s17] ss:$0 sm:$0xff]  ;;  %v657_v16 = vld [vmem:[%s2143_s17 + $0x1] ss:$0 sm:$0xff]  ;;  %p1275_p7 = pnand %p1274_p0, %p2146_p3  ;;  %s1279_s7 = scalar_lea.vmem %s1278_s30, 256 }
 0x203   : > { %461 = vadd.xlane.f32.xlu0 %v460_v3  ;;  %s2050_s10 = scalar_lea.hbm %s2144_s13, %s659_s0  ;;  %p1280_p2 = scmp.lt.s32.totalorder %s2052_s27, %s1278_s30 }
 0x204   : > { %p1276_p11 = pneg %p1275_p7  ;;  %p1281_p12 = scmp.lt.s32.totalorder %s1279_s7, %s1273_s14 }
 0x206   : > { %p1282_p13 = por %p1281_p12, %p1280_p2 }
 0x208   : > { %p1283_p6 = pnand %p1282_p13, %p1276_p11 }
 0x28c   : > { %v458_v4 = vpop.xlane.xlu0 %457 }
 0x28d   : > { %v459_v5 = vmul.f32 0.0078125, %v458_v4 }
 0x28f   : > { %v464_v7 = vmul.f32 %v459_v5, %v459_v5  ;;  %v467_v12 = vsub.f32 %v456_v2, %v459_v5 }
 0x290   : > { %v462_v6 = vpop.xlane.xlu0 %461 }
 0x291   : > { %v463_v8 = vmul.f32 0.0078125, %v462_v6 }
 0x293   : > { %v465_v9 = vsub.f32 %v463_v8, %v464_v7 }
 0x295   : > { %v466_v10 = vmax.f32 %v465_v9, 0.0 }
 0x297   : > { %v468_v11 = vadd.f32 1e-05, %v466_v10 }
 0x299   : > { %785 = vrsqrt.f32 %v468_v11 }
 0x2a3   : > { %v786_v13 = vpop.eup %785 }
 0x2a4   : > { %v470_v15 = vmul.f32 %v786_v13, %v467_v12 }
 0x2a6   : > { %v476_v17 = vmul.f32 %v656_v14, %v470_v15 }
 0x2a8   : > { %v482_v18 = vadd.f32 %v657_v16, %v476_v17 }
 0x2aa   : > { %483 = vst [vmem:[%s161_s5] sm:$0xff] %v482_v18 }
 0x2ab   : > { %1286 = shalt.err (!%p1283_p6)
}
 0x2ac   : > { %s1287_s12 = scalar_lea.hbm %s2050_s10, 128  ;;  %s1291_s29 = scalar_lea.hbm %s2144_s13, 256 }
 0x2ad   : > { %p1288_p4 = scmp.ne.s32.totalorder %s2050_s10, %s1287_s12  ;;  %p1292_p9 = scmp.lt.u32.totalorder %s2050_s10, %s2144_s13 }
 0x2ae   : > { %p1293_p10 = scmp.lt.u32.totalorder %s1291_s29, %s1287_s12  ;;  %p1295_p0 = scmp.lt.u32.totalorder %s1287_s12, %s2050_s10 }
 0x2af   : > { %p1289_p8 = pnand %p1288_p4, %p2146_p3 }
 0x2b0   : > { %p1294_p5 = por %p1293_p10, %p1292_p9 }
 0x2b1   : > { %p1290_p1 = pneg %p1289_p8 }
 0x2b2   : > { %p1296_p7 = por %p1295_p0, %p1294_p5 }
 0x2b4   : > { %p1297_p11 = pnand %p1296_p7, %p1290_p1 }
 0x2b6   : > { %1300 = shalt.err (!%p1297_p11)
}
 0x2b7   : > { %720 = dma.vmem_to_hbm [thread:$0]  (%p2146_p3), %s2052_s27, 128, %s2050_s10, %s485_s19  }
 0x2b8 PF: > { %s2147_s16 = sld [smem:[#allocation67_spill]]  ;;  %s2148_s20 = sld [smem:[#allocation64_spill]] }
 0x2b9   : > { %s2149_s24 = sld [smem:[#allocation69_spill]] }
 0x2be   : > { %p734_p2 = scmp.ge.s32.totalorder %s2147_s16, 2  ;;  %s511_s18 = sand.u32 1, %s2148_s20  }
 0x2bf   : > { %p2150_p12 = scmp.ne.s32.totalorder %s2149_s24, 0  ;;  %s512_s5 = scalar_lea.sflag [#allocation8], %s511_s18 }
 0x2c1   : > { %p727_p13 = pnand %p734_p2, %p2150_p12 }
 0x2c3   : > { %1334 = dma.done.wait (!%p727_p13), %s512_s5, 128  }
 0x2c4   : > { %1336 = vsyncadd (!%p727_p13), %s512_s5, 4294967168  ;;  %s22_s30 = sadd.s32 1, %s2147_s16   ;;  %s2151_s4 = sld [smem:[#allocation65_spill]] }
 0x2c5   : > { %p19_p6 = scmp.ge.s32.totalorder %s22_s30, 4   ;;  %s2152_s27 = sld [smem:[#allocation70_spill]] }
 0x2c6   : > { %s2153_s28 = sld [smem:[#allocation66_spill]]  ;;  %s2154_s29 = sld [smem:[#allocation68_spill]] }
 0x2c7   : > { %s2155_s25 = smov %s1343_s26  ;;  %21 = sbr.rel (!%p19_p6) target bundleno = 18 (0x12), region = 175 }
 0x2ca   : > { %s2156_s26 = smov %s2151_s4 }
 0x2ce   :  { %517 = vsyncpa [#allocation7], 1 }
 0x2cf   :  { %519 = vsyncpa [#allocation7 + $0x1], 1 }
 0x2d0   :  { %520 = vsyncpa [#allocation8], 1 }
 0x2d1   :  { %522 = vsyncpa [#allocation8 + $0x1], 1 }
 0x2d2   :  { %523 = vsyncmov [#allocation3] }
 0x2d5   :  { %s524_s8 = vpop.sfrf %523 }
 0x2d6   :  { %p662_p3 = scmp.ne.s32.totalorder %s524_s8, 0 }
 0x2d8   :  { %528 = shalt.err (%p662_p3)  }
 0x2d9   :  { %530 = vsyncmov [#allocation3 + $0x1] }
 0x2dc   :  { %s531_s9 = vpop.sfrf %530 }
 0x2dd   :  { %p663_p4 = scmp.ne.s32.totalorder %s531_s9, 0 }
 0x2df   :  { %535 = shalt.err (%p663_p4)  }

</bundles_post_ra>
